<compile_context>
chip_gen: v7x
topology: tpu7x:2x2x1
jax: 0.10.0
libtpu: 0.0.40
codegen_flags: <defaults>
</compile_context>

<pallas_src>
import functools
import math

import jax
import jax.numpy as jnp
from jax import lax
from jax.experimental import pallas as pl
from jax.experimental.pallas import tpu as pltpu


# --------------------------------------------------------------------------------------
# helpers
# --------------------------------------------------------------------------------------

def _gelu_tanh(x):
    # GPT-2 "gelu_new" (tanh approximation).
    return 0.5 * x * (1.0 + jnp.tanh(0.7978845608028654 * (x + 0.044715 * x * x * x)))


def _pick_tile(dim, cap):
    """Largest divisor of `dim` that is <= cap (never silently a giant full-dim tile)."""
    if dim <= cap:
        return dim
    for t in range(cap, 0, -1):
        if dim % t == 0:
            return t
    return dim  # unreachable
    # TODO(synk): masked remainder tiles (pl.cdiv grid) for awkward production shapes.


# --------------------------------------------------------------------------------------
# fused LayerNorm + Conv1D/Linear kernel: y = act(LN(x) @ W + b)
#   grid (M//tm, N//tn); LN(x) computed once per row tile (j == 0) into a VMEM scratch
#   and reused for every N tile -> the normalized activation never round-trips HBM.
# --------------------------------------------------------------------------------------

def _make_ln_linear_kernel(eps, activation, mxu_dtype):
    def kernel(x_ref, g_ref, bln_ref, w_ref, b_ref, o_ref, xln_ref):
        j = pl.program_id(1)

        @pl.when(j == 0)
        def _ln():
            x = x_ref[...].astype(jnp.float32)
            mu = jnp.mean(x, axis=-1, keepdims=True)
            xc = x - mu
            var = jnp.mean(xc * xc, axis=-1, keepdims=True)
            xn = xc * lax.rsqrt(var + eps)
            xn = xn * g_ref[...].astype(jnp.float32) + bln_ref[...].astype(jnp.float32)
            xln_ref[...] = xn.astype(xln_ref.dtype)

        y = jnp.dot(xln_ref[...], w_ref[...].astype(mxu_dtype),
                    preferred_element_type=jnp.float32)
        y = y + b_ref[...].astype(jnp.float32)
        if activation == "gelu_new":
            y = _gelu_tanh(y)
        o_ref[...] = y.astype(o_ref.dtype)

    return kernel


def ln_linear(x2d, gamma, beta, w, b, *, eps, activation=None,
              mxu_dtype=jnp.float32, tm_cap=256, tn_cap=256):
    """(M, K) -> act(LN(x) @ W + b), W: (K, N).  K kept whole (LN needs the full row).
    TODO(synk): K-tiled variant with a LN-stats pre-pass for very large n_embd."""
    M, K = x2d.shape
    K2, N = w.shape
    assert K == K2 and b.shape == (N,)
    tm, tn = _pick_tile(M, tm_cap), _pick_tile(N, tn_cap)
    return pl.pallas_call(
        _make_ln_linear_kernel(eps, activation, mxu_dtype),
        grid=(M // tm, N // tn),
        in_specs=[
            pl.BlockSpec((tm, K), lambda i, j: (i, 0)),   # x row tile (same across j)
            pl.BlockSpec((1, K), lambda i, j: (0, 0)),    # LN gamma
            pl.BlockSpec((1, K), lambda i, j: (0, 0)),    # LN beta
            pl.BlockSpec((K, tn), lambda i, j: (0, j)),   # weight column tile
            pl.BlockSpec((1, tn), lambda i, j: (0, j)),   # bias
        ],
        out_specs=pl.BlockSpec((tm, tn), lambda i, j: (i, j)),
        out_shape=jax.ShapeDtypeStruct((M, N), x2d.dtype),
        scratch_shapes=[pltpu.VMEM((tm, K), mxu_dtype)],
        compiler_params=pltpu.CompilerParams(
            # axis 1 must stay sequential per row tile: the LN scratch is filled at j==0
            dimension_semantics=("parallel", "arbitrary")),
    )(x2d, gamma.reshape(1, K), beta.reshape(1, K), w, b.reshape(1, N))


# --------------------------------------------------------------------------------------
# tiled Conv1D/Linear with fused residual add: y = residual + x @ W + b
# --------------------------------------------------------------------------------------

def _make_linear_residual_kernel(mxu_dtype):
    def kernel(x_ref, w_ref, b_ref, r_ref, o_ref, acc_ref):
        k = pl.program_id(2)

        @pl.when(k == 0)
        def _init():
            acc_ref[...] = jnp.zeros_like(acc_ref)

        acc_ref[...] += jnp.dot(
            x_ref[...].astype(mxu_dtype),
            w_ref[...].astype(mxu_dtype),
            preferred_element_type=jnp.float32,
        )

        @pl.when(k == pl.num_programs(2) - 1)
        def _finalize():
            y = acc_ref[...] + b_ref[...].astype(jnp.float32) + r_ref[...].astype(jnp.float32)
            o_ref[...] = y.astype(o_ref.dtype)

    return kernel


def linear_residual(x2d, w, b, residual2d, *, mxu_dtype=jnp.float32,
                    tm_cap=256, tn_cap=256, tk_cap=512):
    """(M, K) @ (K, N) + (N,) + residual(M, N).  fp32 VMEM accumulator, K-tiled."""
    M, K = x2d.shape
    K2, N = w.shape
    assert K == K2 and b.shape == (N,) and residual2d.shape == (M, N)
    tm, tn, tk = _pick_tile(M, tm_cap), _pick_tile(N, tn_cap), _pick_tile(K, tk_cap)
    return pl.pallas_call(
        _make_linear_residual_kernel(mxu_dtype),
        grid=(M // tm, N // tn, K // tk),
        in_specs=[
            pl.BlockSpec((tm, tk), lambda i, j, k: (i, k)),
            pl.BlockSpec((tk, tn), lambda i, j, k: (k, j)),
            pl.BlockSpec((1, tn), lambda i, j, k: (0, j)),
            pl.BlockSpec((tm, tn), lambda i, j, k: (i, j)),   # residual tile
        ],
        out_specs=pl.BlockSpec((tm, tn), lambda i, j, k: (i, j)),
        out_shape=jax.ShapeDtypeStruct((M, N), x2d.dtype),
        scratch_shapes=[pltpu.VMEM((tm, tn), jnp.float32)],
        compiler_params=pltpu.CompilerParams(
            dimension_semantics=("parallel", "parallel", "arbitrary")),
    )(x2d, w, b.reshape(1, N), residual2d)


# --------------------------------------------------------------------------------------
# fused multi-head attention kernel (heads batched through the MXU) + present cache
# --------------------------------------------------------------------------------------

def _pick_h_block(n_head, seq, head_dim, batch, budget_bytes=None):
    """Largest head-block (divisor of n_head) whose working set (incl. double-buffered
    DMA blocks and in-kernel fp32 temporaries) fits the VMEM budget.

    Layout legality for a block: h == n_head, or (h % 8 == 0 and (h*head_dim) % 128 == 0).
    When batch == 1 prefer >= 2 grid steps so both v7x TensorCores get work.
    """
    if budget_bytes is None:
        try:
            cap = getattr(pltpu.get_tpu_info(), "vmem_capacity_bytes", 64 * 1024 * 1024)
        except Exception:
            cap = 64 * 1024 * 1024
        budget_bytes = cap // 4   # conservative: leaves room for compiler internals

    def legal(h):
        return h == n_head or (h % 8 == 0 and (h * head_dim) % 128 == 0)

    def bytes_needed(h):
        io = 4  # qkv/out/present dtype bytes (f32 here)
        qkv_blk = 2 * 3 * seq * h * head_dim * io          # double-buffered qkv block
        out_blk = 2 * seq * h * head_dim * io               # double-buffered out block
        pres_blk = 2 * 2 * h * seq * head_dim * io          # double-buffered present block
        tmps = (4 * h * seq * head_dim + 2 * h * seq * seq) * 4   # q/k/v/o + scores/probs f32
        return qkv_blk + out_blk + pres_blk + tmps

    cands = [h for h in range(n_head, 0, -1) if n_head % h == 0 and legal(h)]
    if batch == 1 and n_head > 1:
        two_step = [h for h in cands if n_head // h >= 2]
        if two_step:
            cands = two_step
    for h in cands:
        if bytes_needed(h) <= budget_bytes:
            return h
    # TODO(synk): flash-style KV tiling (online softmax over Tk tiles) once even the
    # smallest legal head block overflows VMEM at very long context (v7x: 64 MiB/TC).
    return cands[-1]


def _make_attn_kernel(h_block, head_dim, mxu_dtype):
    def kernel(qkv_ref, o_ref, pres_ref):
        # qkv_ref block: (T, 3, h_block, d) slice of the (B, T, 3, H, d) c_attn view.
        qkv = qkv_ref[...]
        qkv_t = jnp.transpose(qkv, (1, 2, 0, 3))          # (3, h_block, T, d), one relayout
        # present = (key^T, value) in (H, T, d) layout: single coalesced block store.
        pres_ref[...] = qkv_t[1:3].astype(pres_ref.dtype)
        q = qkv_t[0].astype(mxu_dtype)                    # 1/sqrt(d) pre-folded into W_q
        k = qkv_t[1].astype(mxu_dtype)
        v = qkv_t[2].astype(mxu_dtype)
        # batched over heads: one MXU stream instead of an unrolled per-head loop
        s = jnp.einsum("hqd,hkd->hqk", q, k, preferred_element_type=jnp.float32)
        s = s - jnp.max(s, axis=-1, keepdims=True)
        p = jnp.exp(s)
        p = p / jnp.sum(p, axis=-1, keepdims=True)        # exact softmax (matches reference)
        o = jnp.einsum("hqk,hkd->hqd", p.astype(mxu_dtype), v,
                       preferred_element_type=jnp.float32)            # (h_block, T, d)
        T = qkv.shape[0]
        # merge_heads: one lane-dense full-width (T, h_block*d) store
        o_ref[...] = jnp.swapaxes(o, 0, 1).reshape(T, h_block * head_dim).astype(o_ref.dtype)

    return kernel


def attention_core(qkv5, *, h_block=None, mxu_dtype=jnp.float32):
    """qkv5: (B, T, 3, H, d) view of the c_attn output (Q already pre-scaled).

    Returns (a, present): a is (B, T, H*d) (merge_heads done),
    present is (2, B, H, T, d) == stack((key^T, value)).
    """
    B, T, three, H, d = qkv5.shape
    assert three == 3
    C = H * d
    if h_block is None:
        h_block = _pick_h_block(H, T, d, B)
    assert H % h_block == 0

    qkv_spec = pl.BlockSpec((None, T, 3, h_block, d), lambda b, hb: (b, 0, 0, hb, 0))
    a_spec = pl.BlockSpec((None, T, h_block * d), lambda b, hb: (b, 0, hb))
    pres_spec = pl.BlockSpec((2, None, h_block, T, d), lambda b, hb: (0, b, hb, 0, 0))

    a, present = pl.pallas_call(
        _make_attn_kernel(h_block, d, mxu_dtype),
        grid=(B, H // h_block),   # both axes parallel -> v7x's two TensorCores split work
        in_specs=[qkv_spec],
        out_specs=(a_spec, pres_spec),
        out_shape=(jax.ShapeDtypeStruct((B, T, C), qkv5.dtype),
                   jax.ShapeDtypeStruct((2, B, H, T, d), qkv5.dtype)),
        compiler_params=pltpu.CompilerParams(
            dimension_semantics=("parallel", "parallel")),
    )(qkv5)
    return a, present


# --------------------------------------------------------------------------------------
# Block / decoder forward (glue between Pallas kernels; reshapes are free views)
# --------------------------------------------------------------------------------------

def attention_decoder_forward(inputs_embeds, params, *, n_head, scale=True,
                              eps=1e-5, mxu_dtype=jnp.float32):
    """Eval-mode AttentionDecoder.forward with default args (use_cache=True, no masks/past).

    Returns (hidden_states, presents), matching the PyTorch output tuple.
    """
    B, T, C = inputs_embeds.shape
    d = C // n_head
    M = B * T
    h2d = inputs_embeds.reshape(M, C)        # embd_pdrop dropout: identity in eval

    # fold 1/sqrt(d) into the Q columns of c_attn weight+bias (cheap one-time transform)
    if scale:
        qscale = jnp.concatenate([jnp.full((C,), 1.0 / math.sqrt(d), jnp.float32),
                                  jnp.ones((2 * C,), jnp.float32)])

    presents = []
    for layer in params["blocks"]:
        c_attn_w, c_attn_b = layer["c_attn_w"], layer["c_attn_b"]
        if scale:
            c_attn_w = c_attn_w * qscale
            c_attn_b = c_attn_b * qscale

        # ---- attention sublayer: x + c_proj(attn(ln_1(x))) ----
        qkv = ln_linear(h2d, layer["ln_1_g"], layer["ln_1_b"], c_attn_w, c_attn_b,
                        eps=eps, mxu_dtype=mxu_dtype)
        qkv5 = qkv.reshape(B, T, 3, n_head, d)     # free view; head split via BlockSpecs
        a, present = attention_core(qkv5, mxu_dtype=mxu_dtype)
        presents.append(present)
        h2d = linear_residual(a.reshape(M, C), layer["c_proj_w"], layer["c_proj_b"],
                              h2d, mxu_dtype=mxu_dtype)

        # ---- MLP sublayer: x + mlp_proj(gelu(c_fc(ln_2(x)))) ----
        m = ln_linear(h2d, layer["ln_2_g"], layer["ln_2_b"], layer["c_fc_w"],
                      layer["c_fc_b"], eps=eps, activation="gelu_new",
                      mxu_dtype=mxu_dtype)
        h2d = linear_residual(m, layer["mlp_proj_w"], layer["mlp_proj_b"], h2d,
                              mxu_dtype=mxu_dtype)

    # final: mlp_f(ln_f(x)); mlp_f is nn.Linear -> weight stored (out, in), pass W^T
    out = ln_linear(h2d, params["ln_f_g"], params["ln_f_b"], params["mlp_f_w"].T,
                    params["mlp_f_b"], eps=eps, mxu_dtype=mxu_dtype)
    return out.reshape(B, T, C), tuple(presents)


# --------------------------------------------------------------------------------------
# pure-JAX reference (mirrors the PyTorch forward exactly) and parameter init
# --------------------------------------------------------------------------------------

def reference_forward(x, params, *, n_head, scale=True, eps=1e-5):
    B, T, C = x.shape
    d = C // n_head

    def ln(h, g, b):
        mu = jnp.mean(h, -1, keepdims=True)
        var = jnp.mean((h - mu) ** 2, -1, keepdims=True)
        return (h - mu) / jnp.sqrt(var + eps) * g + b

    h = x
    presents = []
    for layer in params["blocks"]:
        hl = ln(h, layer["ln_1_g"], layer["ln_1_b"])
        qkv = hl.reshape(B * T, C) @ layer["c_attn_w"] + layer["c_attn_b"]
        q, k, v = jnp.split(qkv.reshape(B, T, 3 * C), 3, axis=-1)
        sh = lambda t: t.reshape(B, T, n_head, d).transpose(0, 2, 1, 3)
        qh, kh, vh = sh(q), sh(k), sh(v)
        w = jnp.einsum("bhqd,bhkd->bhqk", qh, kh)
        if scale:
            w = w / math.sqrt(d)
        w = jax.nn.softmax(w, axis=-1)
        a = jnp.einsum("bhqk,bhkd->bhqd", w, vh)
        a = a.transpose(0, 2, 1, 3).reshape(B * T, C)
        a = a @ layer["c_proj_w"] + layer["c_proj_b"]
        h = h + a.reshape(B, T, C)
        presents.append(jnp.stack([kh, vh]))
        hl2 = ln(h, layer["ln_2_g"], layer["ln_2_b"])
        m = hl2.reshape(B * T, C) @ layer["c_fc_w"] + layer["c_fc_b"]
        m = _gelu_tanh(m)
        m = m @ layer["mlp_proj_w"] + layer["mlp_proj_b"]
        h = h + m.reshape(B, T, C)
    hf = ln(h, params["ln_f_g"], params["ln_f_b"])
    out = hf.reshape(B * T, C) @ params["mlp_f_w"].T + params["mlp_f_b"]
    return out.reshape(B, T, C), tuple(presents)


def init_params(key, *, n_layer, n_embd, std=0.15):
    # std=0.02 is the module's init; we use a larger std so the softmax / residual
    # path is numerically non-degenerate for the correctness check.
    C = n_embd
    blocks = []
    for _ in range(n_layer):
        key, k1, k2, k3, k4 = jax.random.split(key, 5)
        blocks.append({
            "ln_1_g": jnp.ones((C,), jnp.float32), "ln_1_b": jnp.zeros((C,), jnp.float32),
            "c_attn_w": std * jax.random.normal(k1, (C, 3 * C), jnp.float32),
            "c_attn_b": jnp.zeros((3 * C,), jnp.float32),
            "c_proj_w": std * jax.random.normal(k2, (C, C), jnp.float32),
            "c_proj_b": jnp.zeros((C,), jnp.float32),
            "ln_2_g": jnp.ones((C,), jnp.float32), "ln_2_b": jnp.zeros((C,), jnp.float32),
            "c_fc_w": std * jax.random.normal(k3, (C, 4 * C), jnp.float32),
            "c_fc_b": jnp.zeros((4 * C,), jnp.float32),
            "mlp_proj_w": std * jax.random.normal(k4, (4 * C, C), jnp.float32),
            "mlp_proj_b": jnp.zeros((C,), jnp.float32),
        })
    key, k5 = jax.random.split(key)
    return {
        "blocks": blocks,
        "ln_f_g": jnp.ones((C,), jnp.float32), "ln_f_b": jnp.zeros((C,), jnp.float32),
        "mlp_f_w": std * jax.random.normal(k5, (C, C), jnp.float32),  # torch (out, in)
        "mlp_f_b": jnp.zeros((C,), jnp.float32),
    }


# --------------------------------------------------------------------------------------
# main
# --------------------------------------------------------------------------------------

if __name__ == "__main__":
    B, T, C, n_head, n_layer = 2, 8, 32, 4, 2   # n_ctx=8, n_embd=32, head_dim=8
    d = C // n_head

    key = jax.random.PRNGKey(0)
    kp, kx = jax.random.split(key)
    params = init_params(kp, n_layer=n_layer, n_embd=C)
    x = jax.random.normal(kx, (B, T, C), jnp.float32)

    # fp32 MXU operands (exact path)
    fwd = jax.jit(functools.partial(attention_decoder_forward, n_head=n_head, scale=True))
    out, presents = fwd(x, params)
    out = jax.block_until_ready(out)
    presents = jax.block_until_ready(presents)

    ref_out, ref_presents = reference_forward(x, params, n_head=n_head, scale=True)

    assert out.shape == (B, T, C)
    assert len(presents) == n_layer
    for p in presents:
        assert p.shape == (2, B, n_head, T, d)
    assert jnp.allclose(out, ref_out, atol=1e-2, rtol=1e-2), \
        float(jnp.max(jnp.abs(out - ref_out)))
    for p, rp in zip(presents, ref_presents):
        assert jnp.allclose(p, rp, atol=1e-2, rtol=1e-2), \
            float(jnp.max(jnp.abs(p - rp)))

    # bf16 MXU operands (fp32 accumulation / softmax) — loose-tolerance sanity check
    fwd_bf16 = jax.jit(functools.partial(attention_decoder_forward, n_head=n_head,
                                         scale=True, mxu_dtype=jnp.bfloat16))
    out_bf16, _ = fwd_bf16(x, params)
    out_bf16 = jax.block_until_ready(out_bf16)
    assert jnp.allclose(out_bf16, ref_out, atol=2e-1, rtol=2e-1)

    print("KERNEL_OK")
</pallas_src>

<mosaic_0001>
module attributes {stable_mosaic.version = 11 : i64} {
  func.func @kernel(%arg0: i32, %arg1: i32, %arg2: memref<16x32xf32, #tpu.memory_space<vmem>>, %arg3: memref<1x32xf32, #tpu.memory_space<vmem>>, %arg4: memref<1x32xf32, #tpu.memory_space<vmem>>, %arg5: memref<32x96xf32, #tpu.memory_space<vmem>>, %arg6: memref<1x96xf32, #tpu.memory_space<vmem>>, %arg7: memref<16x96xf32, #tpu.memory_space<vmem>>, %arg8: memref<16x32xf32, #tpu.memory_space<vmem>>) attributes {dimension_semantics = [#tpu.dimension_semantics<parallel>, #tpu.dimension_semantics<arbitrary>], iteration_bounds = array<i64: 1, 1>, scalar_prefetch = 0 : i64, scratch_operands = 1 : i64, tpu.core_type = #tpu.core_type<tc>, window_params = [{transform_indices = @transform_0, window_bounds = array<i64: 16, 32>}, {pipeline_mode = #tpu.pipeline_mode<synchronous>, transform_indices = @transform_1, window_bounds = array<i64: 1, 32>}, {pipeline_mode = #tpu.pipeline_mode<synchronous>, transform_indices = @transform_2, window_bounds = array<i64: 1, 32>}, {transform_indices = @transform_3, window_bounds = array<i64: 32, 96>}, {transform_indices = @transform_4, window_bounds = array<i64: 1, 96>}, {transform_indices = @transform_5, window_bounds = array<i64: 16, 96>}]} {
    %c0_i32 = arith.constant 0 : i32
    %0 = arith.cmpi eq, %arg1, %c0_i32 : i32
    %1 = arith.extui %0 : i1 to i32
    %c0_i32_0 = arith.constant 0 : i32
    %2 = arith.cmpi ne, %1, %c0_i32_0 : i32
    scf.if %2 {
      %c0_8 = arith.constant 0 : index
      %c0_9 = arith.constant 0 : index
      %10 = vector.load %arg2[%c0_8, %c0_9] : memref<16x32xf32, #tpu.memory_space<vmem>>, vector<16x32xf32>
      %cst_10 = arith.constant dense<0.000000e+00> : vector<16xf32>
      %11 = vector.multi_reduction <add>, %10, %cst_10 [1] : vector<16x32xf32> to vector<16xf32>
      %12 = vector.shape_cast %11 : vector<16xf32> to vector<16x1xf32>
      %cst_11 = arith.constant 3.200000e+01 : f32
      %13 = vector.broadcast %cst_11 : f32 to vector<16x1xf32>
      %14 = arith.divf %12, %13 : vector<16x1xf32>
      %15 = vector.broadcast %14 : vector<16x1xf32> to vector<16x32xf32>
      %16 = arith.subf %10, %15 : vector<16x32xf32>
      %17 = arith.mulf %16, %16 : vector<16x32xf32>
      %cst_12 = arith.constant dense<0.000000e+00> : vector<16xf32>
      %18 = vector.multi_reduction <add>, %17, %cst_12 [1] : vector<16x32xf32> to vector<16xf32>
      %19 = vector.shape_cast %18 : vector<16xf32> to vector<16x1xf32>
      %cst_13 = arith.constant 3.200000e+01 : f32
      %20 = vector.broadcast %cst_13 : f32 to vector<16x1xf32>
      %21 = arith.divf %19, %20 : vector<16x1xf32>
      %cst_14 = arith.constant 9.99999974E-6 : f32
      %22 = vector.broadcast %cst_14 : f32 to vector<16x1xf32>
      %23 = arith.addf %21, %22 : vector<16x1xf32>
      %24 = math.rsqrt %23 : vector<16x1xf32>
      %25 = vector.broadcast %24 : vector<16x1xf32> to vector<16x32xf32>
      %26 = arith.mulf %16, %25 : vector<16x32xf32>
      %c0_15 = arith.constant 0 : index
      %c0_16 = arith.constant 0 : index
      %27 = vector.load %arg3[%c0_15, %c0_16] : memref<1x32xf32, #tpu.memory_space<vmem>>, vector<1x32xf32>
      %28 = vector.broadcast %27 : vector<1x32xf32> to vector<16x32xf32>
      %29 = arith.mulf %26, %28 : vector<16x32xf32>
      %c0_17 = arith.constant 0 : index
      %c0_18 = arith.constant 0 : index
      %30 = vector.load %arg4[%c0_17, %c0_18] : memref<1x32xf32, #tpu.memory_space<vmem>>, vector<1x32xf32>
      %31 = vector.broadcast %30 : vector<1x32xf32> to vector<16x32xf32>
      %32 = arith.addf %29, %31 : vector<16x32xf32>
      %c0_19 = arith.constant 0 : index
      %c0_20 = arith.constant 0 : index
      %33 = vector.load %arg8[%c0_19, %c0_20] : memref<16x32xf32, #tpu.memory_space<vmem>>, vector<16x32xf32>
      tpu.vector_store %arg8[%c0_19, %c0_20], %32 {strides = array<i32>} : memref<16x32xf32, #tpu.memory_space<vmem>>, vector<16x32xf32>,
    } else {
    }
    %c0 = arith.constant 0 : index
    %c0_1 = arith.constant 0 : index
    %3 = vector.load %arg8[%c0, %c0_1] : memref<16x32xf32, #tpu.memory_space<vmem>>, vector<16x32xf32>
    %c0_2 = arith.constant 0 : index
    %c0_3 = arith.constant 0 : index
    %4 = vector.load %arg5[%c0_2, %c0_3] : memref<32x96xf32, #tpu.memory_space<vmem>>, vector<32x96xf32>
    %cst = arith.constant dense<0.000000e+00> : vector<16x96xf32>
    %5 = tpu.matmul %3, %4, %cst {dimension_numbers = #tpu.dot_dimension_numbers<[1], [0], [0], [1], [0, 0, 1, 1], [], []>} : vector<16x32xf32>, vector<32x96xf32>, vector<16x96xf32> -> vector<16x96xf32>
    %c0_4 = arith.constant 0 : index
    %c0_5 = arith.constant 0 : index
    %6 = vector.load %arg6[%c0_4, %c0_5] : memref<1x96xf32, #tpu.memory_space<vmem>>, vector<1x96xf32>
    %7 = vector.broadcast %6 : vector<1x96xf32> to vector<16x96xf32>
    %8 = arith.addf %5, %7 : vector<16x96xf32>
    %c0_6 = arith.constant 0 : index
    %c0_7 = arith.constant 0 : index
    %9 = vector.load %arg7[%c0_6, %c0_7] : memref<16x96xf32, #tpu.memory_space<vmem>>, vector<16x96xf32>
    tpu.vector_store %arg7[%c0_6, %c0_7], %8 {strides = array<i32>} : memref<16x96xf32, #tpu.memory_space<vmem>>, vector<16x96xf32>,
    return
  }
  func.func @transform_0(%arg0: i32, %arg1: i32) -> (i32, i32) {
    %c0_i32 = arith.constant 0 : i32
    %c0_i32_0 = arith.constant 0 : i32
    return %arg0, %c0_i32 : i32, i32
  }
  func.func @transform_1(%arg0: i32, %arg1: i32) -> (i32, i32) {
    %c0_i32 = arith.constant 0 : i32
    %c0_i32_0 = arith.constant 0 : i32
    %c0_i32_1 = arith.constant 0 : i32
    return %c0_i32, %c0_i32_0 : i32, i32
  }
  func.func @transform_2(%arg0: i32, %arg1: i32) -> (i32, i32) {
    %c0_i32 = arith.constant 0 : i32
    %c0_i32_0 = arith.constant 0 : i32
    %c0_i32_1 = arith.constant 0 : i32
    return %c0_i32, %c0_i32_0 : i32, i32
  }
  func.func @transform_3(%arg0: i32, %arg1: i32) -> (i32, i32) {
    %c0_i32 = arith.constant 0 : i32
    %c0_i32_0 = arith.constant 0 : i32
    return %c0_i32, %arg1 : i32, i32
  }
  func.func @transform_4(%arg0: i32, %arg1: i32) -> (i32, i32) {
    %c0_i32 = arith.constant 0 : i32
    %c0_i32_0 = arith.constant 0 : i32
    return %c0_i32, %arg1 : i32, i32
  }
  func.func @transform_5(%arg0: i32, %arg1: i32) -> (i32, i32) {
    %c0_i32 = arith.constant 0 : i32
    return %arg0, %arg1 : i32, i32
  }
}

module attributes {stable_mosaic.version = 11 : i64} {
  func.func @kernel(%arg0: i32, %arg1: i32, %arg2: i32, %arg3: memref<16x32xf32, #tpu.memory_space<vmem>>, %arg4: memref<32x32xf32, #tpu.memory_space<vmem>>, %arg5: memref<1x32xf32, #tpu.memory_space<vmem>>, %arg6: memref<16x32xf32, #tpu.memory_space<vmem>>, %arg7: memref<16x32xf32, #tpu.memory_space<vmem>>, %arg8: memref<16x32xf32, #tpu.memory_space<vmem>>) attributes {dimension_semantics = [#tpu.dimension_semantics<parallel>, #tpu.dimension_semantics<parallel>, #tpu.dimension_semantics<arbitrary>], iteration_bounds = array<i64: 1, 1, 1>, scalar_prefetch = 0 : i64, scratch_operands = 1 : i64, tpu.core_type = #tpu.core_type<tc>, window_params = [{transform_indices = @transform_0, window_bounds = array<i64: 16, 32>}, {transform_indices = @transform_1, window_bounds = array<i64: 32, 32>}, {transform_indices = @transform_2, window_bounds = array<i64: 1, 32>}, {transform_indices = @transform_3, window_bounds = array<i64: 16, 32>}, {transform_indices = @transform_4, window_bounds = array<i64: 16, 32>}]} {
    %c0_i32 = arith.constant 0 : i32
    %0 = arith.cmpi eq, %arg2, %c0_i32 : i32
    %1 = arith.extui %0 : i1 to i32
    %c0_i32_0 = arith.constant 0 : i32
    %2 = arith.cmpi ne, %1, %c0_i32_0 : i32
    scf.if %2 {
      %cst_10 = arith.constant 0.000000e+00 : f32
      %12 = vector.broadcast %cst_10 : f32 to vector<16x32xf32>
      %c0_11 = arith.constant 0 : index
      %c0_12 = arith.constant 0 : index
      %13 = vector.load %arg8[%c0_11, %c0_12] : memref<16x32xf32, #tpu.memory_space<vmem>>, vector<16x32xf32>
      tpu.vector_store %arg8[%c0_11, %c0_12], %12 {strides = array<i32>} : memref<16x32xf32, #tpu.memory_space<vmem>>, vector<16x32xf32>,
    } else {
    }
    %c0 = arith.constant 0 : index
    %c0_1 = arith.constant 0 : index
    %3 = vector.load %arg8[%c0, %c0_1] : memref<16x32xf32, #tpu.memory_space<vmem>>, vector<16x32xf32>
    %c0_2 = arith.constant 0 : index
    %c0_3 = arith.constant 0 : index
    %4 = vector.load %arg3[%c0_2, %c0_3] : memref<16x32xf32, #tpu.memory_space<vmem>>, vector<16x32xf32>
    %c0_4 = arith.constant 0 : index
    %c0_5 = arith.constant 0 : index
    %5 = vector.load %arg4[%c0_4, %c0_5] : memref<32x32xf32, #tpu.memory_space<vmem>>, vector<32x32xf32>
    %cst = arith.constant dense<0.000000e+00> : vector<16x32xf32>
    %6 = tpu.matmul %4, %5, %cst {dimension_numbers = #tpu.dot_dimension_numbers<[1], [0], [0], [1], [0, 0, 1, 1], [], []>} : vector<16x32xf32>, vector<32x32xf32>, vector<16x32xf32> -> vector<16x32xf32>
    %7 = arith.addf %3, %6 : vector<16x32xf32>
    %c0_6 = arith.constant 0 : index
    %c0_7 = arith.constant 0 : index
    %8 = vector.load %arg8[%c0_6, %c0_7] : memref<16x32xf32, #tpu.memory_space<vmem>>, vector<16x32xf32>
    tpu.vector_store %arg8[%c0_6, %c0_7], %7 {strides = array<i32>} : memref<16x32xf32, #tpu.memory_space<vmem>>, vector<16x32xf32>,
    %c0_i32_8 = arith.constant 0 : i32
    %9 = arith.cmpi eq, %arg2, %c0_i32_8 : i32
    %10 = arith.extui %9 : i1 to i32
    %c0_i32_9 = arith.constant 0 : i32
    %11 = arith.cmpi ne, %10, %c0_i32_9 : i32
    scf.if %11 {
      %c0_10 = arith.constant 0 : index
      %c0_11 = arith.constant 0 : index
      %12 = vector.load %arg8[%c0_10, %c0_11] : memref<16x32xf32, #tpu.memory_space<vmem>>, vector<16x32xf32>
      %c0_12 = arith.constant 0 : index
      %c0_13 = arith.constant 0 : index
      %13 = vector.load %arg5[%c0_12, %c0_13] : memref<1x32xf32, #tpu.memory_space<vmem>>, vector<1x32xf32>
      %14 = vector.broadcast %13 : vector<1x32xf32> to vector<16x32xf32>
      %15 = arith.addf %12, %14 : vector<16x32xf32>
      %c0_14 = arith.constant 0 : index
      %c0_15 = arith.constant 0 : index
      %16 = vector.load %arg6[%c0_14, %c0_15] : memref<16x32xf32, #tpu.memory_space<vmem>>, vector<16x32xf32>
      %17 = arith.addf %15, %16 : vector<16x32xf32>
      %c0_16 = arith.constant 0 : index
      %c0_17 = arith.constant 0 : index
      %18 = vector.load %arg7[%c0_16, %c0_17] : memref<16x32xf32, #tpu.memory_space<vmem>>, vector<16x32xf32>
      tpu.vector_store %arg7[%c0_16, %c0_17], %17 {strides = array<i32>} : memref<16x32xf32, #tpu.memory_space<vmem>>, vector<16x32xf32>,
    } else {
    }
    return
  }
  func.func @transform_0(%arg0: i32, %arg1: i32, %arg2: i32) -> (i32, i32) {
    %c0_i32 = arith.constant 0 : i32
    return %arg0, %arg2 : i32, i32
  }
  func.func @transform_1(%arg0: i32, %arg1: i32, %arg2: i32) -> (i32, i32) {
    %c0_i32 = arith.constant 0 : i32
    return %arg2, %arg1 : i32, i32
  }
  func.func @transform_2(%arg0: i32, %arg1: i32, %arg2: i32) -> (i32, i32) {
    %c0_i32 = arith.constant 0 : i32
    %c0_i32_0 = arith.constant 0 : i32
    return %c0_i32, %arg1 : i32, i32
  }
  func.func @transform_3(%arg0: i32, %arg1: i32, %arg2: i32) -> (i32, i32) {
    %c0_i32 = arith.constant 0 : i32
    return %arg0, %arg1 : i32, i32
  }
  func.func @transform_4(%arg0: i32, %arg1: i32, %arg2: i32) -> (i32, i32) {
    %c0_i32 = arith.constant 0 : i32
    return %arg0, %arg1 : i32, i32
  }
}

module attributes {stable_mosaic.version = 11 : i64} {
  func.func @kernel(%arg0: i32, %arg1: i32, %arg2: memref<1x8x3x4x8xf32, #tpu.memory_space<vmem>>, %arg3: memref<1x8x32xf32, #tpu.memory_space<vmem>>, %arg4: memref<2x1x4x8x8xf32, #tpu.memory_space<vmem>>) attributes {dimension_semantics = [#tpu.dimension_semantics<parallel>, #tpu.dimension_semantics<parallel>], iteration_bounds = array<i64: 2, 1>, scalar_prefetch = 0 : i64, scratch_operands = 0 : i64, tpu.core_type = #tpu.core_type<tc>, window_params = [{transform_indices = @transform_0, window_bounds = array<i64: 1, 8, 3, 4, 8>}, {transform_indices = @transform_1, window_bounds = array<i64: 1, 8, 32>}, {transform_indices = @transform_2, window_bounds = array<i64: 2, 1, 4, 8, 8>}]} {
    %c0 = arith.constant 0 : index
    %c0_0 = arith.constant 0 : index
    %c0_1 = arith.constant 0 : index
    %c0_2 = arith.constant 0 : index
    %c0_3 = arith.constant 0 : index
    %0 = vector.load %arg2[%c0, %c0_0, %c0_1, %c0_2, %c0_3] : memref<1x8x3x4x8xf32, #tpu.memory_space<vmem>>, vector<1x8x3x4x8xf32>
    %1 = vector.shape_cast %0 : vector<1x8x3x4x8xf32> to vector<8x3x4x8xf32>
    %2 = tpu.transpose %1, [1, 2, 0, 3] : vector<8x3x4x8xf32> -> vector<3x4x8x8xf32>
    %3 = vector.extract_strided_slice %2 {offsets = [1, 0, 0, 0], sizes = [2, 4, 8, 8], strides = [1, 1, 1, 1]} : vector<3x4x8x8xf32> to vector<2x4x8x8xf32>
    %c0_4 = arith.constant 0 : index
    %c0_5 = arith.constant 0 : index
    %c0_6 = arith.constant 0 : index
    %c0_7 = arith.constant 0 : index
    %c0_8 = arith.constant 0 : index
    %4 = vector.load %arg4[%c0_4, %c0_5, %c0_6, %c0_7, %c0_8] : memref<2x1x4x8x8xf32, #tpu.memory_space<vmem>>, vector<2x1x4x8x8xf32>
    %5 = vector.shape_cast %4 : vector<2x1x4x8x8xf32> to vector<2x4x8x8xf32>
    %6 = vector.shape_cast %3 : vector<2x4x8x8xf32> to vector<2x1x4x8x8xf32>
    tpu.vector_store %arg4[%c0_4, %c0_5, %c0_6, %c0_7, %c0_8], %6 {strides = array<i32>} : memref<2x1x4x8x8xf32, #tpu.memory_space<vmem>>, vector<2x1x4x8x8xf32>,
    %7 = vector.extract_strided_slice %2 {offsets = [0, 0, 0, 0], sizes = [1, 4, 8, 8], strides = [1, 1, 1, 1]} : vector<3x4x8x8xf32> to vector<1x4x8x8xf32>
    %8 = vector.shape_cast %7 : vector<1x4x8x8xf32> to vector<4x8x8xf32>
    %9 = vector.extract_strided_slice %2 {offsets = [1, 0, 0, 0], sizes = [1, 4, 8, 8], strides = [1, 1, 1, 1]} : vector<3x4x8x8xf32> to vector<1x4x8x8xf32>
    %10 = vector.shape_cast %9 : vector<1x4x8x8xf32> to vector<4x8x8xf32>
    %11 = vector.extract_strided_slice %2 {offsets = [2, 0, 0, 0], sizes = [1, 4, 8, 8], strides = [1, 1, 1, 1]} : vector<3x4x8x8xf32> to vector<1x4x8x8xf32>
    %12 = vector.shape_cast %11 : vector<1x4x8x8xf32> to vector<4x8x8xf32>
    "tpu.trace_start"() <{level = 10 : i32, message = "hqd,hkd->hqk"}> : () -> ()
    %cst = arith.constant dense<0.000000e+00> : vector<4x8x8xf32>
    %13 = tpu.matmul %8, %10, %cst {dimension_numbers = #tpu.dot_dimension_numbers<[2], [2], [1], [1], [0, 0, 0, 1, 1, 1], [0], [0]>} : vector<4x8x8xf32>, vector<4x8x8xf32>, vector<4x8x8xf32> -> vector<4x8x8xf32>
    "tpu.trace_stop"() : () -> ()
    %cst_9 = arith.constant dense<0xFF800000> : vector<4x8xf32>
    %14 = vector.multi_reduction <maximumf>, %13, %cst_9 [2] : vector<4x8x8xf32> to vector<4x8xf32>
    %15 = vector.shape_cast %14 : vector<4x8xf32> to vector<4x8x1xf32>
    %16 = vector.broadcast %15 : vector<4x8x1xf32> to vector<4x8x8xf32>
    %17 = arith.subf %13, %16 : vector<4x8x8xf32>
    %18 = math.exp %17 : vector<4x8x8xf32>
    %cst_10 = arith.constant dense<0.000000e+00> : vector<4x8xf32>
    %19 = vector.multi_reduction <add>, %18, %cst_10 [2] : vector<4x8x8xf32> to vector<4x8xf32>
    %20 = vector.shape_cast %19 : vector<4x8xf32> to vector<4x8x1xf32>
    %21 = vector.broadcast %20 : vector<4x8x1xf32> to vector<4x8x8xf32>
    %22 = arith.divf %18, %21 : vector<4x8x8xf32>
    "tpu.trace_start"() <{level = 10 : i32, message = "hqk,hkd->hqd"}> : () -> ()
    %cst_11 = arith.constant dense<0.000000e+00> : vector<4x8x8xf32>
    %23 = tpu.matmul %22, %12, %cst_11 {dimension_numbers = #tpu.dot_dimension_numbers<[2], [1], [1], [2], [0, 0, 0, 1, 1, 2], [0], [0]>} : vector<4x8x8xf32>, vector<4x8x8xf32>, vector<4x8x8xf32> -> vector<4x8x8xf32>
    "tpu.trace_stop"() : () -> ()
    %24 = tpu.transpose %23, [1, 0, 2] : vector<4x8x8xf32> -> vector<8x4x8xf32>
    %25 = vector.shape_cast %24 : vector<8x4x8xf32> to vector<8x32xf32>
    %c0_12 = arith.constant 0 : index
    %c0_13 = arith.constant 0 : index
    %c0_14 = arith.constant 0 : index
    %26 = vector.load %arg3[%c0_12, %c0_13, %c0_14] : memref<1x8x32xf32, #tpu.memory_space<vmem>>, vector<1x8x32xf32>
    %27 = vector.shape_cast %26 : vector<1x8x32xf32> to vector<8x32xf32>
    %28 = vector.shape_cast %25 : vector<8x32xf32> to vector<1x8x32xf32>
    tpu.vector_store %arg3[%c0_12, %c0_13, %c0_14], %28 {strides = array<i32>} : memref<1x8x32xf32, #tpu.memory_space<vmem>>, vector<1x8x32xf32>,
    return
  }
  func.func @transform_0(%arg0: i32, %arg1: i32) -> (i32, i32, i32, i32, i32) {
    %c0_i32 = arith.constant 0 : i32
    %c0_i32_0 = arith.constant 0 : i32
    %c0_i32_1 = arith.constant 0 : i32
    %c0_i32_2 = arith.constant 0 : i32
    return %arg0, %c0_i32, %c0_i32_0, %arg1, %c0_i32_1 : i32, i32, i32, i32, i32
  }
  func.func @transform_1(%arg0: i32, %arg1: i32) -> (i32, i32, i32) {
    %c0_i32 = arith.constant 0 : i32
    %c0_i32_0 = arith.constant 0 : i32
    return %arg0, %c0_i32, %arg1 : i32, i32, i32
  }
  func.func @transform_2(%arg0: i32, %arg1: i32) -> (i32, i32, i32, i32, i32) {
    %c0_i32 = arith.constant 0 : i32
    %c0_i32_0 = arith.constant 0 : i32
    %c0_i32_1 = arith.constant 0 : i32
    %c0_i32_2 = arith.constant 0 : i32
    return %c0_i32, %arg0, %arg1, %c0_i32_0, %c0_i32_1 : i32, i32, i32, i32, i32
  }
}

module attributes {stable_mosaic.version = 11 : i64} {
  func.func @kernel(%arg0: i32, %arg1: i32, %arg2: memref<16x32xf32, #tpu.memory_space<vmem>>, %arg3: memref<1x32xf32, #tpu.memory_space<vmem>>, %arg4: memref<1x32xf32, #tpu.memory_space<vmem>>, %arg5: memref<32x128xf32, #tpu.memory_space<vmem>>, %arg6: memref<1x128xf32, #tpu.memory_space<vmem>>, %arg7: memref<16x128xf32, #tpu.memory_space<vmem>>, %arg8: memref<16x32xf32, #tpu.memory_space<vmem>>) attributes {dimension_semantics = [#tpu.dimension_semantics<parallel>, #tpu.dimension_semantics<arbitrary>], iteration_bounds = array<i64: 1, 1>, scalar_prefetch = 0 : i64, scratch_operands = 1 : i64, tpu.core_type = #tpu.core_type<tc>, window_params = [{transform_indices = @transform_0, window_bounds = array<i64: 16, 32>}, {pipeline_mode = #tpu.pipeline_mode<synchronous>, transform_indices = @transform_1, window_bounds = array<i64: 1, 32>}, {pipeline_mode = #tpu.pipeline_mode<synchronous>, transform_indices = @transform_2, window_bounds = array<i64: 1, 32>}, {transform_indices = @transform_3, window_bounds = array<i64: 32, 128>}, {transform_indices = @transform_4, window_bounds = array<i64: 1, 128>}, {transform_indices = @transform_5, window_bounds = array<i64: 16, 128>}]} {
    %c0_i32 = arith.constant 0 : i32
    %0 = arith.cmpi eq, %arg1, %c0_i32 : i32
    %1 = arith.extui %0 : i1 to i32
    %c0_i32_0 = arith.constant 0 : i32
    %2 = arith.cmpi ne, %1, %c0_i32_0 : i32
    scf.if %2 {
      %c0_12 = arith.constant 0 : index
      %c0_13 = arith.constant 0 : index
      %23 = vector.load %arg2[%c0_12, %c0_13] : memref<16x32xf32, #tpu.memory_space<vmem>>, vector<16x32xf32>
      %cst_14 = arith.constant dense<0.000000e+00> : vector<16xf32>
      %24 = vector.multi_reduction <add>, %23, %cst_14 [1] : vector<16x32xf32> to vector<16xf32>
      %25 = vector.shape_cast %24 : vector<16xf32> to vector<16x1xf32>
      %cst_15 = arith.constant 3.200000e+01 : f32
      %26 = vector.broadcast %cst_15 : f32 to vector<16x1xf32>
      %27 = arith.divf %25, %26 : vector<16x1xf32>
      %28 = vector.broadcast %27 : vector<16x1xf32> to vector<16x32xf32>
      %29 = arith.subf %23, %28 : vector<16x32xf32>
      %30 = arith.mulf %29, %29 : vector<16x32xf32>
      %cst_16 = arith.constant dense<0.000000e+00> : vector<16xf32>
      %31 = vector.multi_reduction <add>, %30, %cst_16 [1] : vector<16x32xf32> to vector<16xf32>
      %32 = vector.shape_cast %31 : vector<16xf32> to vector<16x1xf32>
      %cst_17 = arith.constant 3.200000e+01 : f32
      %33 = vector.broadcast %cst_17 : f32 to vector<16x1xf32>
      %34 = arith.divf %32, %33 : vector<16x1xf32>
      %cst_18 = arith.constant 9.99999974E-6 : f32
      %35 = vector.broadcast %cst_18 : f32 to vector<16x1xf32>
      %36 = arith.addf %34, %35 : vector<16x1xf32>
      %37 = math.rsqrt %36 : vector<16x1xf32>
      %38 = vector.broadcast %37 : vector<16x1xf32> to vector<16x32xf32>
      %39 = arith.mulf %29, %38 : vector<16x32xf32>
      %c0_19 = arith.constant 0 : index
      %c0_20 = arith.constant 0 : index
      %40 = vector.load %arg3[%c0_19, %c0_20] : memref<1x32xf32, #tpu.memory_space<vmem>>, vector<1x32xf32>
      %41 = vector.broadcast %40 : vector<1x32xf32> to vector<16x32xf32>
      %42 = arith.mulf %39, %41 : vector<16x32xf32>
      %c0_21 = arith.constant 0 : index
      %c0_22 = arith.constant 0 : index
      %43 = vector.load %arg4[%c0_21, %c0_22] : memref<1x32xf32, #tpu.memory_space<vmem>>, vector<1x32xf32>
      %44 = vector.broadcast %43 : vector<1x32xf32> to vector<16x32xf32>
      %45 = arith.addf %42, %44 : vector<16x32xf32>
      %c0_23 = arith.constant 0 : index
      %c0_24 = arith.constant 0 : index
      %46 = vector.load %arg8[%c0_23, %c0_24] : memref<16x32xf32, #tpu.memory_space<vmem>>, vector<16x32xf32>
      tpu.vector_store %arg8[%c0_23, %c0_24], %45 {strides = array<i32>} : memref<16x32xf32, #tpu.memory_space<vmem>>, vector<16x32xf32>,
    } else {
    }
    %c0 = arith.constant 0 : index
    %c0_1 = arith.constant 0 : index
    %3 = vector.load %arg8[%c0, %c0_1] : memref<16x32xf32, #tpu.memory_space<vmem>>, vector<16x32xf32>
    %c0_2 = arith.constant 0 : index
    %c0_3 = arith.constant 0 : index
    %4 = vector.load %arg5[%c0_2, %c0_3] : memref<32x128xf32, #tpu.memory_space<vmem>>, vector<32x128xf32>
    %cst = arith.constant dense<0.000000e+00> : vector<16x128xf32>
    %5 = tpu.matmul %3, %4, %cst {dimension_numbers = #tpu.dot_dimension_numbers<[1], [0], [0], [1], [0, 0, 1, 1], [], []>} : vector<16x32xf32>, vector<32x128xf32>, vector<16x128xf32> -> vector<16x128xf32>
    %c0_4 = arith.constant 0 : index
    %c0_5 = arith.constant 0 : index
    %6 = vector.load %arg6[%c0_4, %c0_5] : memref<1x128xf32, #tpu.memory_space<vmem>>, vector<1x128xf32>
    %7 = vector.broadcast %6 : vector<1x128xf32> to vector<16x128xf32>
    %8 = arith.addf %5, %7 : vector<16x128xf32>
    %cst_6 = arith.constant 5.000000e-01 : f32
    %9 = vector.broadcast %cst_6 : f32 to vector<16x128xf32>
    %10 = arith.mulf %9, %8 : vector<16x128xf32>
    %cst_7 = arith.constant 4.471500e-02 : f32
    %11 = vector.broadcast %cst_7 : f32 to vector<16x128xf32>
    %12 = arith.mulf %11, %8 : vector<16x128xf32>
    %13 = arith.mulf %12, %8 : vector<16x128xf32>
    %14 = arith.mulf %13, %8 : vector<16x128xf32>
    %15 = arith.addf %8, %14 : vector<16x128xf32>
    %cst_8 = arith.constant 0.797884583 : f32
    %16 = vector.broadcast %cst_8 : f32 to vector<16x128xf32>
    %17 = arith.mulf %16, %15 : vector<16x128xf32>
    %18 = math.tanh %17 : vector<16x128xf32>
    %cst_9 = arith.constant 1.000000e+00 : f32
    %19 = vector.broadcast %cst_9 : f32 to vector<16x128xf32>
    %20 = arith.addf %19, %18 : vector<16x128xf32>
    %21 = arith.mulf %10, %20 : vector<16x128xf32>
    %c0_10 = arith.constant 0 : index
    %c0_11 = arith.constant 0 : index
    %22 = vector.load %arg7[%c0_10, %c0_11] : memref<16x128xf32, #tpu.memory_space<vmem>>, vector<16x128xf32>
    tpu.vector_store %arg7[%c0_10, %c0_11], %21 {strides = array<i32>} : memref<16x128xf32, #tpu.memory_space<vmem>>, vector<16x128xf32>,
    return
  }
  func.func @transform_0(%arg0: i32, %arg1: i32) -> (i32, i32) {
    %c0_i32 = arith.constant 0 : i32
    %c0_i32_0 = arith.constant 0 : i32
    return %arg0, %c0_i32 : i32, i32
  }
  func.func @transform_1(%arg0: i32, %arg1: i32) -> (i32, i32) {
    %c0_i32 = arith.constant 0 : i32
    %c0_i32_0 = arith.constant 0 : i32
    %c0_i32_1 = arith.constant 0 : i32
    return %c0_i32, %c0_i32_0 : i32, i32
  }
  func.func @transform_2(%arg0: i32, %arg1: i32) -> (i32, i32) {
    %c0_i32 = arith.constant 0 : i32
    %c0_i32_0 = arith.constant 0 : i32
    %c0_i32_1 = arith.constant 0 : i32
    return %c0_i32, %c0_i32_0 : i32, i32
  }
  func.func @transform_3(%arg0: i32, %arg1: i32) -> (i32, i32) {
    %c0_i32 = arith.constant 0 : i32
    %c0_i32_0 = arith.constant 0 : i32
    return %c0_i32, %arg1 : i32, i32
  }
  func.func @transform_4(%arg0: i32, %arg1: i32) -> (i32, i32) {
    %c0_i32 = arith.constant 0 : i32
    %c0_i32_0 = arith.constant 0 : i32
    return %c0_i32, %arg1 : i32, i32
  }
  func.func @transform_5(%arg0: i32, %arg1: i32) -> (i32, i32) {
    %c0_i32 = arith.constant 0 : i32
    return %arg0, %arg1 : i32, i32
  }
}

module attributes {stable_mosaic.version = 11 : i64} {
  func.func @kernel(%arg0: i32, %arg1: i32, %arg2: i32, %arg3: memref<16x128xf32, #tpu.memory_space<vmem>>, %arg4: memref<128x32xf32, #tpu.memory_space<vmem>>, %arg5: memref<1x32xf32, #tpu.memory_space<vmem>>, %arg6: memref<16x32xf32, #tpu.memory_space<vmem>>, %arg7: memref<16x32xf32, #tpu.memory_space<vmem>>, %arg8: memref<16x32xf32, #tpu.memory_space<vmem>>) attributes {dimension_semantics = [#tpu.dimension_semantics<parallel>, #tpu.dimension_semantics<parallel>, #tpu.dimension_semantics<arbitrary>], iteration_bounds = array<i64: 1, 1, 1>, scalar_prefetch = 0 : i64, scratch_operands = 1 : i64, tpu.core_type = #tpu.core_type<tc>, window_params = [{transform_indices = @transform_0, window_bounds = array<i64: 16, 128>}, {transform_indices = @transform_1, window_bounds = array<i64: 128, 32>}, {transform_indices = @transform_2, window_bounds = array<i64: 1, 32>}, {transform_indices = @transform_3, window_bounds = array<i64: 16, 32>}, {transform_indices = @transform_4, window_bounds = array<i64: 16, 32>}]} {
    %c0_i32 = arith.constant 0 : i32
    %0 = arith.cmpi eq, %arg2, %c0_i32 : i32
    %1 = arith.extui %0 : i1 to i32
    %c0_i32_0 = arith.constant 0 : i32
    %2 = arith.cmpi ne, %1, %c0_i32_0 : i32
    scf.if %2 {
      %cst_10 = arith.constant 0.000000e+00 : f32
      %12 = vector.broadcast %cst_10 : f32 to vector<16x32xf32>
      %c0_11 = arith.constant 0 : index
      %c0_12 = arith.constant 0 : index
      %13 = vector.load %arg8[%c0_11, %c0_12] : memref<16x32xf32, #tpu.memory_space<vmem>>, vector<16x32xf32>
      tpu.vector_store %arg8[%c0_11, %c0_12], %12 {strides = array<i32>} : memref<16x32xf32, #tpu.memory_space<vmem>>, vector<16x32xf32>,
    } else {
    }
    %c0 = arith.constant 0 : index
    %c0_1 = arith.constant 0 : index
    %3 = vector.load %arg8[%c0, %c0_1] : memref<16x32xf32, #tpu.memory_space<vmem>>, vector<16x32xf32>
    %c0_2 = arith.constant 0 : index
    %c0_3 = arith.constant 0 : index
    %4 = vector.load %arg3[%c0_2, %c0_3] : memref<16x128xf32, #tpu.memory_space<vmem>>, vector<16x128xf32>
    %c0_4 = arith.constant 0 : index
    %c0_5 = arith.constant 0 : index
    %5 = vector.load %arg4[%c0_4, %c0_5] : memref<128x32xf32, #tpu.memory_space<vmem>>, vector<128x32xf32>
    %cst = arith.constant dense<0.000000e+00> : vector<16x32xf32>
    %6 = tpu.matmul %4, %5, %cst {dimension_numbers = #tpu.dot_dimension_numbers<[1], [0], [0], [1], [0, 0, 1, 1], [], []>} : vector<16x128xf32>, vector<128x32xf32>, vector<16x32xf32> -> vector<16x32xf32>
    %7 = arith.addf %3, %6 : vector<16x32xf32>
    %c0_6 = arith.constant 0 : index
    %c0_7 = arith.constant 0 : index
    %8 = vector.load %arg8[%c0_6, %c0_7] : memref<16x32xf32, #tpu.memory_space<vmem>>, vector<16x32xf32>
    tpu.vector_store %arg8[%c0_6, %c0_7], %7 {strides = array<i32>} : memref<16x32xf32, #tpu.memory_space<vmem>>, vector<16x32xf32>,
    %c0_i32_8 = arith.constant 0 : i32
    %9 = arith.cmpi eq, %arg2, %c0_i32_8 : i32
    %10 = arith.extui %9 : i1 to i32
    %c0_i32_9 = arith.constant 0 : i32
    %11 = arith.cmpi ne, %10, %c0_i32_9 : i32
    scf.if %11 {
      %c0_10 = arith.constant 0 : index
      %c0_11 = arith.constant 0 : index
      %12 = vector.load %arg8[%c0_10, %c0_11] : memref<16x32xf32, #tpu.memory_space<vmem>>, vector<16x32xf32>
      %c0_12 = arith.constant 0 : index
      %c0_13 = arith.constant 0 : index
      %13 = vector.load %arg5[%c0_12, %c0_13] : memref<1x32xf32, #tpu.memory_space<vmem>>, vector<1x32xf32>
      %14 = vector.broadcast %13 : vector<1x32xf32> to vector<16x32xf32>
      %15 = arith.addf %12, %14 : vector<16x32xf32>
      %c0_14 = arith.constant 0 : index
      %c0_15 = arith.constant 0 : index
      %16 = vector.load %arg6[%c0_14, %c0_15] : memref<16x32xf32, #tpu.memory_space<vmem>>, vector<16x32xf32>
      %17 = arith.addf %15, %16 : vector<16x32xf32>
      %c0_16 = arith.constant 0 : index
      %c0_17 = arith.constant 0 : index
      %18 = vector.load %arg7[%c0_16, %c0_17] : memref<16x32xf32, #tpu.memory_space<vmem>>, vector<16x32xf32>
      tpu.vector_store %arg7[%c0_16, %c0_17], %17 {strides = array<i32>} : memref<16x32xf32, #tpu.memory_space<vmem>>, vector<16x32xf32>,
    } else {
    }
    return
  }
  func.func @transform_0(%arg0: i32, %arg1: i32, %arg2: i32) -> (i32, i32) {
    %c0_i32 = arith.constant 0 : i32
    return %arg0, %arg2 : i32, i32
  }
  func.func @transform_1(%arg0: i32, %arg1: i32, %arg2: i32) -> (i32, i32) {
    %c0_i32 = arith.constant 0 : i32
    return %arg2, %arg1 : i32, i32
  }
  func.func @transform_2(%arg0: i32, %arg1: i32, %arg2: i32) -> (i32, i32) {
    %c0_i32 = arith.constant 0 : i32
    %c0_i32_0 = arith.constant 0 : i32
    return %c0_i32, %arg1 : i32, i32
  }
  func.func @transform_3(%arg0: i32, %arg1: i32, %arg2: i32) -> (i32, i32) {
    %c0_i32 = arith.constant 0 : i32
    return %arg0, %arg1 : i32, i32
  }
  func.func @transform_4(%arg0: i32, %arg1: i32, %arg2: i32) -> (i32, i32) {
    %c0_i32 = arith.constant 0 : i32
    return %arg0, %arg1 : i32, i32
  }
}

module attributes {stable_mosaic.version = 11 : i64} {
  func.func @kernel(%arg0: i32, %arg1: i32, %arg2: memref<16x32xf32, #tpu.memory_space<vmem>>, %arg3: memref<1x32xf32, #tpu.memory_space<vmem>>, %arg4: memref<1x32xf32, #tpu.memory_space<vmem>>, %arg5: memref<32x32xf32, #tpu.memory_space<vmem>>, %arg6: memref<1x32xf32, #tpu.memory_space<vmem>>, %arg7: memref<16x32xf32, #tpu.memory_space<vmem>>, %arg8: memref<16x32xf32, #tpu.memory_space<vmem>>) attributes {dimension_semantics = [#tpu.dimension_semantics<parallel>, #tpu.dimension_semantics<arbitrary>], iteration_bounds = array<i64: 1, 1>, scalar_prefetch = 0 : i64, scratch_operands = 1 : i64, tpu.core_type = #tpu.core_type<tc>, window_params = [{transform_indices = @transform_0, window_bounds = array<i64: 16, 32>}, {pipeline_mode = #tpu.pipeline_mode<synchronous>, transform_indices = @transform_1, window_bounds = array<i64: 1, 32>}, {pipeline_mode = #tpu.pipeline_mode<synchronous>, transform_indices = @transform_2, window_bounds = array<i64: 1, 32>}, {transform_indices = @transform_3, window_bounds = array<i64: 32, 32>}, {transform_indices = @transform_4, window_bounds = array<i64: 1, 32>}, {transform_indices = @transform_5, window_bounds = array<i64: 16, 32>}]} {
    %c0_i32 = arith.constant 0 : i32
    %0 = arith.cmpi eq, %arg1, %c0_i32 : i32
    %1 = arith.extui %0 : i1 to i32
    %c0_i32_0 = arith.constant 0 : i32
    %2 = arith.cmpi ne, %1, %c0_i32_0 : i32
    scf.if %2 {
      %c0_8 = arith.constant 0 : index
      %c0_9 = arith.constant 0 : index
      %10 = vector.load %arg2[%c0_8, %c0_9] : memref<16x32xf32, #tpu.memory_space<vmem>>, vector<16x32xf32>
      %cst_10 = arith.constant dense<0.000000e+00> : vector<16xf32>
      %11 = vector.multi_reduction <add>, %10, %cst_10 [1] : vector<16x32xf32> to vector<16xf32>
      %12 = vector.shape_cast %11 : vector<16xf32> to vector<16x1xf32>
      %cst_11 = arith.constant 3.200000e+01 : f32
      %13 = vector.broadcast %cst_11 : f32 to vector<16x1xf32>
      %14 = arith.divf %12, %13 : vector<16x1xf32>
      %15 = vector.broadcast %14 : vector<16x1xf32> to vector<16x32xf32>
      %16 = arith.subf %10, %15 : vector<16x32xf32>
      %17 = arith.mulf %16, %16 : vector<16x32xf32>
      %cst_12 = arith.constant dense<0.000000e+00> : vector<16xf32>
      %18 = vector.multi_reduction <add>, %17, %cst_12 [1] : vector<16x32xf32> to vector<16xf32>
      %19 = vector.shape_cast %18 : vector<16xf32> to vector<16x1xf32>
      %cst_13 = arith.constant 3.200000e+01 : f32
      %20 = vector.broadcast %cst_13 : f32 to vector<16x1xf32>
      %21 = arith.divf %19, %20 : vector<16x1xf32>
      %cst_14 = arith.constant 9.99999974E-6 : f32
      %22 = vector.broadcast %cst_14 : f32 to vector<16x1xf32>
      %23 = arith.addf %21, %22 : vector<16x1xf32>
      %24 = math.rsqrt %23 : vector<16x1xf32>
      %25 = vector.broadcast %24 : vector<16x1xf32> to vector<16x32xf32>
      %26 = arith.mulf %16, %25 : vector<16x32xf32>
      %c0_15 = arith.constant 0 : index
      %c0_16 = arith.constant 0 : index
      %27 = vector.load %arg3[%c0_15, %c0_16] : memref<1x32xf32, #tpu.memory_space<vmem>>, vector<1x32xf32>
      %28 = vector.broadcast %27 : vector<1x32xf32> to vector<16x32xf32>
      %29 = arith.mulf %26, %28 : vector<16x32xf32>
      %c0_17 = arith.constant 0 : index
      %c0_18 = arith.constant 0 : index
      %30 = vector.load %arg4[%c0_17, %c0_18] : memref<1x32xf32, #tpu.memory_space<vmem>>, vector<1x32xf32>
      %31 = vector.broadcast %30 : vector<1x32xf32> to vector<16x32xf32>
      %32 = arith.addf %29, %31 : vector<16x32xf32>
      %c0_19 = arith.constant 0 : index
      %c0_20 = arith.constant 0 : index
      %33 = vector.load %arg8[%c0_19, %c0_20] : memref<16x32xf32, #tpu.memory_space<vmem>>, vector<16x32xf32>
      tpu.vector_store %arg8[%c0_19, %c0_20], %32 {strides = array<i32>} : memref<16x32xf32, #tpu.memory_space<vmem>>, vector<16x32xf32>,
    } else {
    }
    %c0 = arith.constant 0 : index
    %c0_1 = arith.constant 0 : index
    %3 = vector.load %arg8[%c0, %c0_1] : memref<16x32xf32, #tpu.memory_space<vmem>>, vector<16x32xf32>
    %c0_2 = arith.constant 0 : index
    %c0_3 = arith.constant 0 : index
    %4 = vector.load %arg5[%c0_2, %c0_3] : memref<32x32xf32, #tpu.memory_space<vmem>>, vector<32x32xf32>
    %cst = arith.constant dense<0.000000e+00> : vector<16x32xf32>
    %5 = tpu.matmul %3, %4, %cst {dimension_numbers = #tpu.dot_dimension_numbers<[1], [0], [0], [1], [0, 0, 1, 1], [], []>} : vector<16x32xf32>, vector<32x32xf32>, vector<16x32xf32> -> vector<16x32xf32>
    %c0_4 = arith.constant 0 : index
    %c0_5 = arith.constant 0 : index
    %6 = vector.load %arg6[%c0_4, %c0_5] : memref<1x32xf32, #tpu.memory_space<vmem>>, vector<1x32xf32>
    %7 = vector.broadcast %6 : vector<1x32xf32> to vector<16x32xf32>
    %8 = arith.addf %5, %7 : vector<16x32xf32>
    %c0_6 = arith.constant 0 : index
    %c0_7 = arith.constant 0 : index
    %9 = vector.load %arg7[%c0_6, %c0_7] : memref<16x32xf32, #tpu.memory_space<vmem>>, vector<16x32xf32>
    tpu.vector_store %arg7[%c0_6, %c0_7], %8 {strides = array<i32>} : memref<16x32xf32, #tpu.memory_space<vmem>>, vector<16x32xf32>,
    return
  }
  func.func @transform_0(%arg0: i32, %arg1: i32) -> (i32, i32) {
    %c0_i32 = arith.constant 0 : i32
    %c0_i32_0 = arith.constant 0 : i32
    return %arg0, %c0_i32 : i32, i32
  }
  func.func @transform_1(%arg0: i32, %arg1: i32) -> (i32, i32) {
    %c0_i32 = arith.constant 0 : i32
    %c0_i32_0 = arith.constant 0 : i32
    %c0_i32_1 = arith.constant 0 : i32
    return %c0_i32, %c0_i32_0 : i32, i32
  }
  func.func @transform_2(%arg0: i32, %arg1: i32) -> (i32, i32) {
    %c0_i32 = arith.constant 0 : i32
    %c0_i32_0 = arith.constant 0 : i32
    %c0_i32_1 = arith.constant 0 : i32
    return %c0_i32, %c0_i32_0 : i32, i32
  }
  func.func @transform_3(%arg0: i32, %arg1: i32) -> (i32, i32) {
    %c0_i32 = arith.constant 0 : i32
    %c0_i32_0 = arith.constant 0 : i32
    return %c0_i32, %arg1 : i32, i32
  }
  func.func @transform_4(%arg0: i32, %arg1: i32) -> (i32, i32) {
    %c0_i32 = arith.constant 0 : i32
    %c0_i32_0 = arith.constant 0 : i32
    return %c0_i32, %arg1 : i32, i32
  }
  func.func @transform_5(%arg0: i32, %arg1: i32) -> (i32, i32) {
    %c0_i32 = arith.constant 0 : i32
    return %arg0, %arg1 : i32, i32
  }
}

</mosaic_0001>

<bundles_post_ra>
// kernel: attention_decoder_forward.11
= control target key start
LH: loop header
LB: loop body
LE: loop exit
PB: predicated region body
PF: predicated region fallthrough
CT: control target
= control target key end

     0   :  { %vm26_vm0 = vcmask 261120   ;;  %vm169_vm1 = vcmask 785408   ;;  %s281_s0 = inlined_call_operand.vmem [shape: f32[16,32], index: 0, kind: input, shape index: {}]   ;;  %s282_s3 = inlined_call_operand.vmem [shape: f32[32,96], index: 3, kind: input, shape index: {}]   ;;  %s283_s1 = inlined_call_operand.vmem [shape: f32[1,32], index: 1, kind: input, shape index: {}]   ;;  %s284_s2 = inlined_call_operand.vmem [shape: f32[1,32], index: 2, kind: input, shape index: {}]   ;;  %s285_s4 = inlined_call_operand.vmem [shape: f32[1,96], index: 4, kind: input, shape index: {}]   ;;  %s286_s5 = inlined_call_operand.vmem [shape: f32[16,96], index: 5, kind: output, shape index: {}]  }
   0x1   :  { %v24_v0 = vld [vmem:[%s281_s0] sm:$0xff]  ;;  %v25_v1 = vld [vmem:[%s281_s0 + $0x8] sm:$0xff]  ;;  %v78_v17 = vld [vmem:[%s282_s3 + $0x10] sm:$0xff] }
   0x2   :  { %v27_v2 = vsel %vm26_vm0, %v24_v0, 0.0  ;;  %v30_v3 = vsel %vm26_vm0, %v25_v1, 0.0  ;;  %v76_v14 = vld [vmem:[%s282_s3] sm:$0xff]  ;;  %v77_v15 = vld [vmem:[%s282_s3 + $0x8] sm:$0xff]  ;;  %v79_v18 = vld [vmem:[%s282_s3 + $0x18] sm:$0xff] }
   0x3   :  { %28 = vadd.xlane.f32.xlu0 %v27_v2  ;;  %v198_v16 = vpack.c.bf16 %v77_v15, %v76_v14  ;;  %v202_v19 = vpack.c.bf16 %v79_v18, %v78_v17  ;;  %v176_v27 = vld [vmem:[%s283_s1] ss:$0 sm:$0xff] }
   0x4   :  { %v177_v29 = vld [vmem:[%s284_s2] ss:$0 sm:$0xff] }
   0x5   :  { %199 = vmatprep.subr.bf16.mxu0 %v198_v16  ;;  %v178_v38 = vld [vmem:[%s285_s4] ss:$0 sm:$0xff] }
   0x6   :  { %201 = vmatpush3.bf16.msra.mxu0 %v198_v16 }
   0x7   :  { %31 = vadd.xlane.f32.xlu0 %v30_v3  ;;  %203 = vmatprep.subr.bf16.mxu0 %v202_v19 }
   0xa   :  { %205 = vmatpush3.bf16.msra.mxu0 %v202_v19 }
  0x90   :  { %v29_v4 = vpop.xlane.xlu0 %28 }
  0x91   :  { %v34_v5 = vmul.f32 0.03125, %v29_v4 }
  0x93   :  { %v36_v6 = vsub.f32 %v24_v0, %v34_v5 }
  0x94   :  { %v32_v7 = vpop.xlane.xlu0 %31 }
  0x95   :  { %v35_v8 = vmul.f32 0.03125, %v32_v7  ;;  %v38_v9 = vmul.f32 %v36_v6, %v36_v6 }
  0x97   :  { %v37_v10 = vsub.f32 %v25_v1, %v35_v8  ;;  %v40_v11 = vsel %vm26_vm0, %v38_v9, 0.0 }
  0x98   :  { %41 = vadd.xlane.f32.xlu1 %v40_v11 }
  0x99   :  { %v39_v12 = vmul.f32 %v37_v10, %v37_v10 }
  0x9b   :  { %v43_v13 = vsel %vm26_vm0, %v39_v12, 0.0 }
  0x9c   :  { %44 = vadd.xlane.f32.xlu1 %v43_v13 }
 0x125   :  { %v42_v20 = vpop.xlane.xlu1 %41 }
 0x126   :  { %v46_v21 = vmul.f32 0.03125, %v42_v20 }
 0x128   :  { %v48_v22 = vadd.f32 1e-05, %v46_v21 }
 0x129   :  { %v45_v23 = vpop.xlane.xlu1 %44 }
 0x12a   :  { %206 = vrsqrt.f32 %v48_v22  ;;  %v47_v24 = vmul.f32 0.03125, %v45_v23 }
 0x12c   :  { %v49_v25 = vadd.f32 1e-05, %v47_v24 }
 0x12e   :  { %208 = vrsqrt.f32 %v49_v25 }
 0x134   :  { %v207_v26 = vpop.eup %206 }
 0x135   :  { %v52_v28 = vmul.f32 %v207_v26, %v36_v6 }
 0x137   :  { %v61_v30 = vmul.f32 %v176_v27, %v52_v28 }
 0x138   :  { %v209_v31 = vpop.eup %208 }
 0x139   :  { %v70_v32 = vadd.f32 %v177_v29, %v61_v30  ;;  %v53_v33 = vmul.f32 %v209_v31, %v37_v10 }
 0x13b   :  { %72 = vst.msk [vmem:[#allocation2] sm:$0xff] %vm26_vm0, %v70_v32  ;;  %v62_v34 = vmul.f32 %v176_v27, %v53_v33 }
 0x13d   :  { %v71_v35 = vadd.f32 %v177_v29, %v62_v34 }
 0x13f   :  { %73 = vst.msk [vmem:[#allocation2 + $0x8] sm:$0xff] %vm26_vm0, %v71_v35 }
 0x142   :  { %v74_v36 = vld [vmem:[#allocation2] sm:$0xff] }
 0x143   :  { %195 = vmatprep.mubr.msk.f32.mxu0 %vm26_vm0, %v74_v36 }
 0x146   :  { %v75_v37 = vld [vmem:[#allocation2 + $0x8] sm:$0xff] }
 0x147   :  { %196 = vmatmul.mubr.msk.f32.vlgmr.msra.gmra.mrb[0].mxu0 %vm26_vm0, %v75_v37 }
 0x21a   :  { %v197_v39 = vpop.f32.mrb[0].mxu0 }
 0x21b   :  { %v166_v40 = vadd.f32 %v197_v39, %v178_v38  ;;  %v160_v41 = vpop.f32.mrb[1].mxu0 }
 0x21c   :  { %v161_v42 = vadd.f32 %v178_v38, %v160_v41 }
 0x21d   :  { %171 = vst.msk [vmem:[%s286_s5 + $0x8] sm:$0xff] %vm169_vm1, %v166_v40 }
 0x21e   :  { %170 = vst.msk [vmem:[%s286_s5] sm:$0xff] %vm169_vm1, %v161_v42 }

// kernel: attention_decoder_forward.13
= control target key start
LH: loop header
LB: loop body
LE: loop exit
PB: predicated region body
PF: predicated region fallthrough
CT: control target
= control target key end

     0   :  { %vm21_vm0 = vcmask 261120   ;;  %v171_v3 = vmov 0.0   ;;  %s238_s1 = inlined_call_operand.vmem [shape: f32[32,32], index: 1, kind: input, shape index: {}]   ;;  %s239_s0 = inlined_call_operand.vmem [shape: f32[16,32], index: 0, kind: input, shape index: {}]   ;;  %s240_s2 = inlined_call_operand.vmem [shape: f32[1,32], index: 2, kind: input, shape index: {}]   ;;  %s241_s3 = inlined_call_operand.vmem [shape: f32[16,32], index: 3, kind: input, shape index: {}]   ;;  %s242_s4 = inlined_call_operand.vmem [shape: f32[16,32], index: 4, kind: output, shape index: {}]  }
   0x1   :  { %v28_v0 = vld [vmem:[%s238_s1] sm:$0xff]  ;;  %v29_v1 = vld [vmem:[%s238_s1 + $0x8] sm:$0xff]  ;;  %v30_v2 = vld [vmem:[%s238_s1 + $0x10] sm:$0xff]  ;;  %23 = vst.msk [vmem:[#allocation2 + $0x8] sm:$0xff] %vm21_vm0, %v171_v3 }
   0x2   :  { %22 = vst.msk [vmem:[#allocation2] sm:$0xff] %vm21_vm0, %v171_v3  ;;  %v162_v4 = vpack.c.bf16 %v29_v1, %v28_v0  ;;  %v31_v5 = vld [vmem:[%s238_s1 + $0x18] sm:$0xff]  ;;  %v26_v6 = vld [vmem:[%s239_s0] sm:$0xff]  ;;  %v27_v8 = vld [vmem:[%s239_s0 + $0x8] sm:$0xff] }
   0x3   :  { %v166_v7 = vpack.c.bf16 %v31_v5, %v30_v2  ;;  %159 = vmatprep.mubr.msk.f32.mxu0 %vm21_vm0, %v26_v6  ;;  %v144_v15 = vld [vmem:[%s240_s2] ss:$0 sm:$0xff]  ;;  %v133_v17 = vld [vmem:[%s241_s3 + $0x8] sm:$0xff] }
   0x4   :  { %163 = vmatprep.subr.bf16.mxu0 %v162_v4  ;;  %v132_v20 = vld [vmem:[%s241_s3] sm:$0xff] }
   0x5   :  { %165 = vmatpush3.bf16.msra.mxu0 %v162_v4 }
   0x6   :  { %167 = vmatprep.subr.bf16.mxu0 %v166_v7 }
   0x8   :  { %v25_v9 = vld [vmem:[#allocation2 + $0x8] sm:$0xff] }
   0x9   :  { %169 = vmatpush3.bf16.msra.mxu0 %v166_v7  ;;  %v24_v10 = vld [vmem:[#allocation2] sm:$0xff] }
   0xc   :  { %160 = vmatmul.mubr.msk.f32.vlgmr.msra.gmra.mrb[0].mxu0 %vm21_vm0, %v27_v8 }
  0xdf   :  { %v161_v11 = vpop.f32.mrb[0].mxu0 }
  0xe0   :  { %v115_v12 = vadd.f32 %v161_v11, %v25_v9  ;;  %v105_v13 = vpop.f32.mrb[1].mxu0 }
  0xe1   :  { %v114_v14 = vadd.f32 %v105_v13, %v24_v10 }
  0xe2   :  { %117 = vst.msk [vmem:[#allocation2 + $0x8] sm:$0xff] %vm21_vm0, %v115_v12 }
  0xe3   :  { %116 = vst.msk [vmem:[#allocation2] sm:$0xff] %vm21_vm0, %v114_v14 }
  0xe9   :  { %v122_v16 = vld [vmem:[#allocation2 + $0x8] sm:$0xff] }
  0xea   :  { %v131_v18 = vadd.f32 %v144_v15, %v122_v16  ;;  %v121_v19 = vld [vmem:[#allocation2] sm:$0xff] }
  0xeb   :  { %v130_v21 = vadd.f32 %v144_v15, %v121_v19 }
  0xec   :  { %v135_v22 = vadd.f32 %v133_v17, %v131_v18 }
  0xed   :  { %v134_v23 = vadd.f32 %v132_v20, %v130_v21 }
  0xee   :  { %137 = vst.msk [vmem:[%s242_s4 + $0x8] sm:$0xff] %vm21_vm0, %v135_v22 }
  0xef   :  { %136 = vst.msk [vmem:[%s242_s4] sm:$0xff] %vm21_vm0, %v134_v23 }

// kernel: attention_decoder_forward.14
= control target key start
LH: loop header
LB: loop body
LE: loop exit
PB: predicated region body
PF: predicated region fallthrough
CT: control target
= control target key end

     0   :  { %vm26_vm0 = vcmask 261120   ;;  %s302_s0 = inlined_call_operand.vmem [shape: f32[16,32], index: 0, kind: input, shape index: {}]   ;;  %s303_s3 = inlined_call_operand.vmem [shape: f32[32,128], index: 3, kind: input, shape index: {}]   ;;  %s304_s1 = inlined_call_operand.vmem [shape: f32[1,32], index: 1, kind: input, shape index: {}]   ;;  %s305_s2 = inlined_call_operand.vmem [shape: f32[1,32], index: 2, kind: input, shape index: {}]   ;;  %s306_s4 = inlined_call_operand.vmem [shape: f32[1,128], index: 4, kind: input, shape index: {}]   ;;  %s307_s5 = inlined_call_operand.vmem [shape: f32[16,128], index: 5, kind: output, shape index: {}]  }
   0x1   :  { %v24_v0 = vld [vmem:[%s302_s0] sm:$0xff]  ;;  %v25_v1 = vld [vmem:[%s302_s0 + $0x8] sm:$0xff]  ;;  %v78_v17 = vld [vmem:[%s303_s3 + $0x10] sm:$0xff] }
   0x2   :  { %v27_v2 = vsel %vm26_vm0, %v24_v0, 0.0  ;;  %v30_v3 = vsel %vm26_vm0, %v25_v1, 0.0  ;;  %v76_v14 = vld [vmem:[%s303_s3] sm:$0xff]  ;;  %v77_v15 = vld [vmem:[%s303_s3 + $0x8] sm:$0xff]  ;;  %v79_v18 = vld [vmem:[%s303_s3 + $0x18] sm:$0xff] }
   0x3   :  { %28 = vadd.xlane.f32.xlu0 %v27_v2  ;;  %v215_v16 = vpack.c.bf16 %v77_v15, %v76_v14  ;;  %v219_v19 = vpack.c.bf16 %v79_v18, %v78_v17  ;;  %v193_v27 = vld [vmem:[%s304_s1] ss:$0 sm:$0xff] }
   0x4   :  { %v194_v29 = vld [vmem:[%s305_s2] ss:$0 sm:$0xff] }
   0x5   :  { %216 = vmatprep.subr.bf16.mxu0 %v215_v16  ;;  %v195_v38 = vld [vmem:[%s306_s4] ss:$0 sm:$0xff] }
   0x6   :  { %218 = vmatpush3.bf16.msra.mxu0 %v215_v16 }
   0x7   :  { %31 = vadd.xlane.f32.xlu0 %v30_v3  ;;  %220 = vmatprep.subr.bf16.mxu0 %v219_v19 }
   0xa   :  { %222 = vmatpush3.bf16.msra.mxu0 %v219_v19 }
  0x90   :  { %v29_v4 = vpop.xlane.xlu0 %28 }
  0x91   :  { %v34_v5 = vmul.f32 0.03125, %v29_v4 }
  0x93   :  { %v36_v6 = vsub.f32 %v24_v0, %v34_v5 }
  0x94   :  { %v32_v7 = vpop.xlane.xlu0 %31 }
  0x95   :  { %v35_v8 = vmul.f32 0.03125, %v32_v7  ;;  %v38_v9 = vmul.f32 %v36_v6, %v36_v6 }
  0x97   :  { %v37_v10 = vsub.f32 %v25_v1, %v35_v8  ;;  %v40_v11 = vsel %vm26_vm0, %v38_v9, 0.0 }
  0x98   :  { %41 = vadd.xlane.f32.xlu1 %v40_v11 }
  0x99   :  { %v39_v12 = vmul.f32 %v37_v10, %v37_v10 }
  0x9b   :  { %v43_v13 = vsel %vm26_vm0, %v39_v12, 0.0 }
  0x9c   :  { %44 = vadd.xlane.f32.xlu1 %v43_v13 }
 0x125   :  { %v42_v20 = vpop.xlane.xlu1 %41 }
 0x126   :  { %v46_v21 = vmul.f32 0.03125, %v42_v20 }
 0x128   :  { %v48_v22 = vadd.f32 1e-05, %v46_v21 }
 0x129   :  { %v45_v23 = vpop.xlane.xlu1 %44 }
 0x12a   :  { %223 = vrsqrt.f32 %v48_v22  ;;  %v47_v24 = vmul.f32 0.03125, %v45_v23 }
 0x12c   :  { %v49_v25 = vadd.f32 1e-05, %v47_v24 }
 0x12e   :  { %225 = vrsqrt.f32 %v49_v25 }
 0x134   :  { %v224_v26 = vpop.eup %223 }
 0x135   :  { %v52_v28 = vmul.f32 %v224_v26, %v36_v6 }
 0x137   :  { %v61_v30 = vmul.f32 %v193_v27, %v52_v28 }
 0x138   :  { %v226_v31 = vpop.eup %225 }
 0x139   :  { %v70_v32 = vadd.f32 %v194_v29, %v61_v30  ;;  %v53_v33 = vmul.f32 %v226_v31, %v37_v10 }
 0x13b   :  { %72 = vst.msk [vmem:[#allocation2] sm:$0xff] %vm26_vm0, %v70_v32  ;;  %v62_v34 = vmul.f32 %v193_v27, %v53_v33 }
 0x13d   :  { %v71_v35 = vadd.f32 %v194_v29, %v62_v34 }
 0x13f   :  { %73 = vst.msk [vmem:[#allocation2 + $0x8] sm:$0xff] %vm26_vm0, %v71_v35 }
 0x142   :  { %v74_v36 = vld [vmem:[#allocation2] sm:$0xff] }
 0x143   :  { %212 = vmatprep.mubr.msk.f32.mxu0 %vm26_vm0, %v74_v36 }
 0x146   :  { %v75_v37 = vld [vmem:[#allocation2 + $0x8] sm:$0xff] }
 0x147   :  { %213 = vmatmul.mubr.msk.f32.vlgmr.msra.gmra.mrb[0].mxu0 %vm26_vm0, %v75_v37 }
 0x21a   :  { %v214_v39 = vpop.f32.mrb[0].mxu0 }
 0x21b   :  { %v166_v40 = vadd.f32 %v214_v39, %v195_v38  ;;  %v160_v41 = vpop.f32.mrb[1].mxu0 }
 0x21c   :  { %v161_v42 = vadd.f32 %v195_v38, %v160_v41 }
 0x21d   :  { %v172_v43 = vmul.f32 0.044715, %v166_v40  ;;  %v170_v55 = vmul.f32 0.5, %v166_v40 }
 0x21e   :  { %v171_v44 = vmul.f32 0.044715, %v161_v42  ;;  %v169_v57 = vmul.f32 0.5, %v161_v42 }
 0x21f   :  { %v174_v45 = vmul.f32 %v172_v43, %v166_v40 }
 0x220   :  { %v173_v46 = vmul.f32 %v171_v44, %v161_v42 }
 0x221   :  { %v176_v47 = vmul.f32 %v174_v45, %v166_v40 }
 0x222   :  { %v175_v48 = vmul.f32 %v173_v46, %v161_v42 }
 0x223   :  { %v178_v49 = vadd.f32 %v176_v47, %v166_v40 }
 0x224   :  { %v177_v50 = vadd.f32 %v175_v48, %v161_v42 }
 0x225   :  { %v180_v51 = vmul.f32 0.7978846, %v178_v49 }
 0x226   :  { %v179_v52 = vmul.f32 0.7978846, %v177_v50 }
 0x227   :  { %227 = vtanh.f32 %v180_v51 }
 0x228   :  { %229 = vtanh.f32 %v179_v52 }
 0x231   :  { %v228_v53 = vpop.eup %227 }
 0x232   :  { %v230_v54 = vpop.eup %229  ;;  %v184_v56 = vadd.f32 1.0, %v228_v53 }
 0x233   :  { %v183_v58 = vadd.f32 1.0, %v230_v54 }
 0x234   :  { %v186_v59 = vmul.f32 %v184_v56, %v170_v55 }
 0x235   :  { %v185_v60 = vmul.f32 %v183_v58, %v169_v57 }
 0x236   :  { %188 = vst [vmem:[%s307_s5 + $0x8] sm:$0xff] %v186_v59 }
 0x237   :  { %187 = vst [vmem:[%s307_s5] sm:$0xff] %v185_v60 }

// kernel: attention_decoder_forward.12
= control target key start
LH: loop header
LB: loop body
LE: loop exit
PB: predicated region body
PF: predicated region fallthrough
CT: control target
= control target key end

     0   :  { %8 = vsyncpa [#allocation3], 0  ;;  %s1890_s0 = inlined_call_operand.vmem [shape: f32[2,8,3,4,8], index: 0, kind: input, shape index: {}]   ;;  %s1891_s1 = inlined_call_operand.vmem [shape: f32[2,8,32], index: 1, kind: output, shape index: {0}]   ;;  %s1892_s2 = inlined_call_operand.hbm [shape: f32[2,2,4,8,8], index: 2, kind: output, shape index: {1}]  }
   0x1   :  { %10 = vsyncpa [#allocation3 + $0x1], 0  ;;  %s1653_s9 = smov 0   ;;  %s1655_s10 = smov 0  }
   0x2   :  { %s1657_s11 = smov 0   ;;  %s1659_s12 = smov 0  }
   0x3   :  { %s1661_s13 = smov 0   ;;  %s1663_s14 = smov 0  }
   0x4 LB: > { %s1384_s15 = sadd.s32 4294967295, %s1622_s14   ;;  %s1385_s16 = sadd.s32 4294967294, %s1622_s14   ;;  %s1622_s14 = sphi %s1663_s14, %s16_s14   ;;  %s1618_s13 = sphi %s1661_s13, %s1899_s13   ;;  %s1614_s12 = sphi %s1659_s12, %s1898_s12   ;;  %s1610_s11 = sphi %s1657_s11, %s1897_s11   ;;  %s1606_s10 = sphi %s1655_s10, %s1896_s10   ;;  %s1602_s9 = sphi %s1653_s9, %s1895_s9  }
   0x5   : > { %s28_s17 = sadd.s32 1, %s1618_s13  ;;  %s93_s18 = sadd.s32 1, %s1610_s11 }
   0x6   : > { %p30_p0 = scmp.ge.s32.totalorder %s28_s17, 2  ;;  %p103_p1 = scmp.ne.s32.totalorder %s1610_s11, %s1606_s10 }
   0x7   : > { %p104_p2 = scmp.eq.s32.totalorder %s1384_s15, 1  ;;  %p109_p3 = scmp.ne.s32.totalorder %s1606_s10, %s1602_s9 }
   0x8   : > { %s1901_s17 = smov (%p30_p0, %s28_s17), 0  ;;  %p110_p5 = scmp.eq.s32.totalorder %s1385_s16, 1 }
   0x9   : > { %p1693_p4 = por %p104_p2, %p103_p1  ;;  %s88_s20 = ssub.s32 %s1618_s13, %s1901_s17 }
   0xa   : > { %p1388_p6 = scmp.ge.s32.totalorder %s1622_s14, 1  ;;  %p91_p7 = scmp.eq.s32.totalorder %s88_s20, 0 }
   0xb   : > { %p1700_p8 = por %p110_p5, %p109_p3  ;;  %p139_p9 = scmp.lt.s32.totalorder %s1622_s14, 3 }
   0xc   : > { %s1706_s22 = scalar_select %p91_p7, %s1610_s11, %s93_s18  }
   0xd   : > { %p140_p10 = pnand %p1388_p6, %p139_p9 }
   0xe   : > { %s168_s23 = sand.u32 (!%p140_p10), 1, %s1606_s10   ;;  %p171_p11 = scmp.lt.s32.totalorder (!%p140_p10), %s1614_s12, 1  ;;  %v215_v0 = vlaneseq (!%p140_p10)  ;;  %v1624_v1 = vmov (!%p140_p10), 0.0   ;;  %v1625_v2 = vmov (!%p140_p10), 1983009808   ;;  %vm1626_vm0 = vmmov (!%p140_p10), 0  }
   0xf   : > { %143 = sbr.rel (%p140_p10) target bundleno = 934 (0x3a6), region = 24  ;;  %1428 = vmatprep.subr.mxu0 (!%p140_p10), %v1624_v1  ;;  %v213_v3 = vunpack.c.l.s4 (!%p140_p10), %v1625_v2  ;;  %1433 = vmatprep.subr.mxu1 (!%p140_p10), %v1624_v1  ;;  %v1627_v6 = vmov (!%p140_p10), 1934713408   ;;  %s1722_s26 = sshll.u32 (!%p140_p10), %s168_s23, 6  ;;  %vm415_vm1 = vcmask (!%p140_p10), 64512   ;;  %vm1213_vm2 = vcmask (!%p140_p10), 130048  }
  0x10   : > { %1430 = vmatprep.mubr.msk.f32.mxu0 (!%p140_p10), %vm1626_vm0, %v1624_v1  ;;  %1435 = vmatprep.mubr.msk.f32.mxu1 (!%p140_p10), %vm1626_vm0, %v1624_v1  ;;  %v216_v5 = vshrl.u32 (!%p140_p10), %v215_v0, 7  ;;  %v246_v7 = vunpack.c.l.s4 (!%p140_p10), %v1627_v6  ;;  %s1754_s30 = scalar_lea.vmem (!%p140_p10), [#allocation2], %s1722_s26  ;;  %s1628_s3 = smov (!%p140_p10), 16   ;;  %vm1215_vm3 = vcmask (!%p140_p10), 195584   ;;  %vm1217_vm4 = vcmask (!%p140_p10), 261120  }
  0x11   : > { %v214_v4 = vunpack.c.0.s8 (!%p140_p10), %v213_v3  ;;  %s1629_s4 = smov (!%p140_p10), 8   ;;  %s1630_s5 = smov (!%p140_p10), 24  }
  0x12   : > { %v247_v9 = vunpack.c.0.s8 (!%p140_p10), %v246_v7  ;;  %s1227_s16 = scalar_lea.sflag (!%p140_p10), [#allocation3], %s168_s23 }
  0x13   : > { %v1729_v8 = vsub.s32 (!%p140_p10), %v214_v4, %v216_v5 }
  0x14   : > { %v1736_v15 = vsub.s32 (!%p140_p10), %v247_v9, %v216_v5 }
  0x16   : > { %s1717_s24 = scalar_select %p171_p11, %s1614_s12, 1 }
  0x18   : > { %s1468_s25 = smul.u32 96, %s1717_s24  ;;  %s1391_s6 = sshll.u32 %s1717_s24, 3 }
  0x19   : > { %s185_s15 = scalar_lea.vmem %s1891_s1, %s1391_s6 }
  0x1a   : > { %s1727_s29 = scalar_lea.vmem %s1890_s0, %s1468_s25 }
  0x1b   : > { %v1544_v10 = vld [vmem:[%s1727_s29 + $0x4] ss:$24 sps:$4 sm:$0xff]   ;;  %v1545_v11 = vld [vmem:[%s1727_s29 + $0x10] ss:$24 sps:$4 sm:$0xff]   ;;  %v1546_v12 = vld [vmem:[%s1727_s29 + $0x34] ss:$24 sps:$4 sm:$0xff]  }
  0x1c   : > { %v1547_v13 = vld [vmem:[%s1727_s29 + $0x40] ss:$24 sps:$4 sm:$0xff]   ;;  %v286_v14 = vrot.slane %v1544_v10, %v1729_v8  ;;  %v294_v16 = vrot.slane %v1545_v11, %v1729_v8  ;;  %v302_v17 = vrot.slane %v1546_v12, %v1729_v8  ;;  %v1549_v24 = vld [vmem:[%s1727_s29 + $0xc] ss:$24 sps:$4 sm:$0xff]   ;;  %v1550_v25 = vld [vmem:[%s1727_s29 + $0x30] ss:$24 sps:$4 sm:$0xff]  }
  0x1d   : > { %v310_v18 = vrot.slane %v1547_v13, %v1729_v8  ;;  %v1548_v19 = vld [vmem:[%s1727_s29] ss:$24 sps:$4 sm:$0xff]   ;;  %v1551_v26 = vld [vmem:[%s1727_s29 + $0x3c] ss:$24 sps:$4 sm:$0xff]   ;;  %v226_v30 = vrot.slane %v1549_v24, %v1729_v8  ;;  %v234_v31 = vrot.slane %v1550_v25, %v1729_v8 }
  0x1e   : > { %v311_v20 = vcombine.low %v286_v14, %v294_v16  ;;  %v312_v21 = vcombine.high %v286_v14, %v294_v16  ;;  %v218_v27 = vrot.slane %v1548_v19, %v1729_v8  ;;  %v242_v32 = vrot.slane %v1551_v26, %v1729_v8  ;;  %v1554_v24 = vld [vmem:[%s1727_s29 + $0x38] ss:$24 sps:$4 sm:$0xff]   ;;  %v1555_v25 = vld [vmem:[%s1727_s29 + $0x44] ss:$24 sps:$4 sm:$0xff]  }
  0x1f   : > { %v327_v22 = vcombine.low %v302_v17, %v310_v18  ;;  %v328_v23 = vcombine.high %v302_v17, %v310_v18 }
  0x20   : > { %v319_v28 = vrot.slane %v311_v20, %v1736_v15  ;;  %v326_v33 = vrot.slane %v312_v21, %v1736_v15  ;;  %v243_v36 = vcombine.low %v218_v27, %v226_v30  ;;  %v244_v37 = vcombine.high %v218_v27, %v226_v30 }
  0x21   : > { %v335_v29 = vrot.slane %v327_v22, %v1736_v15  ;;  %v342_v34 = vrot.slane %v328_v23, %v1736_v15  ;;  %v259_v39 = vcombine.low %v234_v31, %v242_v32  ;;  %v260_v40 = vcombine.high %v234_v31, %v242_v32  ;;  %v1552_v22 = vld [vmem:[%s1727_s29 + $0x8] ss:$24 sps:$4 sm:$0xff]   ;;  %v1553_v23 = vld [vmem:[%s1727_s29 + $0x14] ss:$24 sps:$4 sm:$0xff]  }
  0x22   : > { %v251_v43 = vrot.slane %v243_v36, %v1736_v15  ;;  %v258_v45 = vrot.slane %v244_v37, %v1736_v15  ;;  %v354_v26 = vrot.slane %v1552_v22, %v1729_v8  ;;  %v362_v27 = vrot.slane %v1553_v23, %v1729_v8 }
  0x23   : > { %v343_v35 = vcombine.low %v319_v28, %v335_v29  ;;  %v344_v38 = vcombine.high %v319_v28, %v335_v29  ;;  %v345_v41 = vcombine.low %v326_v33, %v342_v34  ;;  %v346_v42 = vcombine.high %v326_v33, %v342_v34 }
  0x24   : > { %v267_v44 = vrot.slane %v259_v39, %v1736_v15  ;;  %v274_v46 = vrot.slane %v260_v40, %v1736_v15  ;;  %v370_v28 = vrot.slane %v1554_v24, %v1729_v8  ;;  %v378_v29 = vrot.slane %v1555_v25, %v1729_v8 }
  0x25   : > { %416 = vst.msk [vmem:[%s1754_s30] sm:$0xff] %vm415_vm1, %v343_v35  ;;  %1429 = vmatpush3.xpose.msk.msra.mxu0 %vm415_vm1, %v343_v35  ;;  %417 = vst.msk [vmem:[%s1754_s30 + $0x8] sm:$0xff] %vm415_vm1, %v344_v38  ;;  %1434 = vmatpush3.xpose.msk.msra.mxu1 %vm415_vm1, %v344_v38  ;;  %v379_v30 = vcombine.low %v354_v26, %v362_v27  ;;  %v380_v34 = vcombine.high %v354_v26, %v362_v27 }
  0x26   : > { %1438 = vmatprep.subr.mxu0 %v1624_v1  ;;  %418 = vst.msk [vmem:[%s1754_s30 + $0x10] sm:$0xff] %vm415_vm1, %v345_v41  ;;  %1443 = vmatprep.subr.mxu1 %v1624_v1  ;;  %419 = vst.msk [vmem:[%s1754_s30 + $0x18] sm:$0xff] %vm415_vm1, %v346_v42  ;;  %v275_v47 = vcombine.low %v251_v43, %v267_v44  ;;  %v276_v48 = vcombine.high %v251_v43, %v267_v44 }
  0x27   : > { %v277_v49 = vcombine.low %v258_v45, %v274_v46  ;;  %v278_v50 = vcombine.high %v258_v45, %v274_v46  ;;  %v395_v31 = vcombine.low %v370_v28, %v378_v29  ;;  %v387_v32 = vrot.slane %v379_v30, %v1736_v15 }
  0x28   : > { %1431 = vmatmul.mubr.msk.f32.vlgmr.msra.gmra.mrb[0].mxu0 %vm415_vm1, %v275_v47  ;;  %1436 = vmatmul.mubr.msk.f32.vlgmr.msra.gmra.mrb[0].mxu1 %vm415_vm1, %v276_v48  ;;  %v396_v35 = vcombine.high %v370_v28, %v378_v29  ;;  %v394_v37 = vrot.slane %v380_v34, %v1736_v15 }
  0x29   : > { %1439 = vmatpush3.xpose.msk.msra.mxu0 %vm415_vm1, %v345_v41  ;;  %1440 = vmatprep.mubr.msk.f32.mxu0 %vm1626_vm0, %v1624_v1  ;;  %v403_v33 = vrot.slane %v395_v31, %v1736_v15 }
  0x2a   : > { %1444 = vmatpush3.xpose.msk.msra.mxu1 %vm415_vm1, %v346_v42  ;;  %1445 = vmatprep.mubr.msk.f32.mxu1 %vm1626_vm0, %v1624_v1  ;;  %v410_v38 = vrot.slane %v396_v35, %v1736_v15 }
  0x2b   : > { %1448 = vmatprep.subr.mxu0 %v1624_v1  ;;  %1453 = vmatprep.subr.mxu1 %v1624_v1  ;;  %v411_v36 = vcombine.low %v387_v32, %v403_v33  ;;  %v412_v39 = vcombine.high %v387_v32, %v403_v33 }
  0x2c   : > { %1441 = vmatmul.mubr.msk.f32.vlgmr.msra.gmra.mrb[2].mxu0 %vm415_vm1, %v277_v49  ;;  %v413_v40 = vcombine.low %v394_v37, %v410_v38  ;;  %v414_v41 = vcombine.high %v394_v37, %v410_v38 }
  0x2d   : > { %1446 = vmatmul.mubr.msk.f32.vlgmr.msra.gmra.mrb[2].mxu1 %vm415_vm1, %v278_v50  ;;  %1450 = vmatprep.mubr.msk.f32.mxu0 %vm1626_vm0, %v1624_v1  ;;  %420 = vst.msk [vmem:[%s1754_s30 + $0x20] sm:$0xff] %vm415_vm1, %v411_v36  ;;  %421 = vst.msk [vmem:[%s1754_s30 + $0x28] sm:$0xff] %vm415_vm1, %v412_v39 }
  0x2e   : > { %1455 = vmatprep.mubr.msk.f32.mxu1 %vm1626_vm0, %v1624_v1  ;;  %1449 = vmatpush3.msra.mxu0 %v411_v36  ;;  %422 = vst.msk [vmem:[%s1754_s30 + $0x30] sm:$0xff] %vm415_vm1, %v413_v40  ;;  %423 = vst.msk [vmem:[%s1754_s30 + $0x38] sm:$0xff] %vm415_vm1, %v414_v41 }
  0x2f   : > { %1458 = vmatprep.subr.mxu0 %v1624_v1  ;;  %1454 = vmatpush3.msra.mxu1 %v412_v39 }
  0x30   : > { %1463 = vmatprep.subr.mxu1 %v1624_v1 }
  0xfb   : > { %v496_v51 = vpop.f32.mrb[0].mxu0  ;;  %v572_v52 = vpop.f32.mrb[0].mxu1 }
  0xfc   : > { %v1432_v53 = vpop.f32.mrb[1].mxu0  ;;  %v728_v54 = vsel %vm415_vm1, %v496_v51, -inf  ;;  %v1437_v55 = vpop.f32.mrb[1].mxu1  ;;  %v731_v56 = vsel %vm415_vm1, %v572_v52, -inf }
  0xfd   : > { %729 = vmax.xlane.f32.xlu0 %v728_v54 }
  0xff   : > { %v648_v57 = vpop.f32.mrb[2].mxu0 }
 0x100   : > { %v1442_v58 = vpop.f32.mrb[3].mxu0  ;;  %v734_v59 = vsel %vm415_vm1, %v648_v57, -inf  ;;  %v724_v60 = vpop.f32.mrb[2].mxu1 }
 0x101   : > { %732 = vmax.xlane.f32.xlu0 %v731_v56  ;;  %735 = vmax.xlane.f32.xlu1 %v734_v59  ;;  %v1447_v61 = vpop.f32.mrb[3].mxu1  ;;  %v737_v62 = vsel %vm415_vm1, %v724_v60, -inf }
 0x105   : > { %738 = vmax.xlane.f32.xlu1 %v737_v62 }
 0x18a   : > { %v730_v63 = vpop.xlane.xlu0 %729 }
 0x18b   : > { %v740_v0 = vsub.f32 %v496_v51, %v730_v63 }
 0x18d   : > { %v744_v2 = vmul.f32 1.442695, %v740_v0 }
 0x18e   : > { %v733_v3 = vpop.xlane.xlu0 %732  ;;  %v736_v4 = vpop.xlane.xlu1 %735 }
 0x18f   : > { %1556 = vpow2.f32 %v744_v2  ;;  %v741_v5 = vsub.f32 %v572_v52, %v733_v3  ;;  %v742_v6 = vsub.f32 %v648_v57, %v736_v4 }
 0x191   : > { %v746_v7 = vmul.f32 1.442695, %v741_v5  ;;  %v748_v9 = vmul.f32 1.442695, %v742_v6 }
 0x192   : > { %v739_v10 = vpop.xlane.xlu1 %738 }
 0x193   : > { %1558 = vpow2.f32 %v746_v7  ;;  %v743_v11 = vsub.f32 %v724_v60, %v739_v10 }
 0x194   : > { %1560 = vpow2.f32 %v748_v9 }
 0x195   : > { %v750_v12 = vmul.f32 1.442695, %v743_v11 }
 0x197   : > { %1562 = vpow2.f32 %v750_v12 }
 0x199   : > { %v1557_v13 = vpop.eup %1556 }
 0x19a   : > { %v752_v14 = vsel %vm415_vm1, %v1557_v13, 0.0 }
 0x19b   : > { %753 = vadd.xlane.f32.xlu0 %v752_v14 }
 0x19d   : > { %v1559_v16 = vpop.eup %1558 }
 0x19e   : > { %v1561_v17 = vpop.eup %1560  ;;  %v755_v18 = vsel %vm415_vm1, %v1559_v16, 0.0 }
 0x19f   : > { %756 = vadd.xlane.f32.xlu1 %v755_v18  ;;  %v758_v19 = vsel %vm415_vm1, %v1561_v17, 0.0 }
 0x1a0   : > { %759 = vadd.xlane.f32.xlu0 %v758_v19 }
 0x1a1   : > { %v1563_v20 = vpop.eup %1562 }
 0x1a2   : > { %v761_v21 = vsel %vm415_vm1, %v1563_v20, 0.0 }
 0x1a3   : > { %762 = vadd.xlane.f32.xlu1 %v761_v21 }
 0x228   : > { %v754_v42 = vpop.xlane.xlu0 %753 }
 0x229   : > { %1564 = vrcp.f32 %v754_v42 }
 0x22c   : > { %v757_v43 = vpop.xlane.xlu1 %756 }
 0x22d   : > { %v760_v44 = vpop.xlane.xlu0 %759  ;;  %1566 = vrcp.f32 %v757_v43 }
 0x22e   : > { %1568 = vrcp.f32 %v760_v44 }
 0x230   : > { %v763_v45 = vpop.xlane.xlu1 %762 }
 0x231   : > { %1570 = vrcp.f32 %v763_v45 }
 0x233   : > { %v1565_v46 = vpop.eup %1564 }
 0x234   : > { %v765_v47 = vmul.f32 %v1565_v46, %v1557_v13 }
 0x236   : > { %1451 = vmatmul.mubr.msk.f32.vlgmr.msra.gmra.mrb[4].mxu0 %vm415_vm1, %v765_v47 }
 0x237   : > { %v1567_v48 = vpop.eup %1566  ;;  %1459 = vmatpush3.msra.mxu0 %v413_v40  ;;  %1460 = vmatprep.mubr.msk.f32.mxu0 %vm1626_vm0, %v1624_v1 }
 0x238   : > { %v1569_v49 = vpop.eup %1568  ;;  %v767_v50 = vmul.f32 %v1567_v48, %v1559_v16 }
 0x239   : > { %v769_v51 = vmul.f32 %v1569_v49, %v1561_v17 }
 0x23a   : > { %1456 = vmatmul.mubr.msk.f32.vlgmr.msra.gmra.mrb[4].mxu1 %vm415_vm1, %v767_v50 }
 0x23b   : > { %v1571_v52 = vpop.eup %1570  ;;  %1461 = vmatmul.mubr.msk.f32.vlgmr.msra.gmra.mrb[6].mxu0 %vm415_vm1, %v769_v51  ;;  %1464 = vmatpush3.msra.mxu1 %v414_v41 }
 0x23c   : > { %v771_v53 = vmul.f32 %v1571_v52, %v1563_v20  ;;  %1465 = vmatprep.mubr.msk.f32.mxu1 %vm1626_vm0, %v1624_v1 }
 0x23e   : > { %1466 = vmatmul.mubr.msk.f32.vlgmr.msra.gmra.mrb[6].mxu1 %vm415_vm1, %v771_v53 }
 0x309   : > { %v841_v54 = vpop.f32.mrb[4].mxu0 }
 0x30a   : > { %v1452_v55 = vpop.f32.mrb[5].mxu0 }
 0x30d   : > { %v914_v56 = vpop.f32.mrb[4].mxu1 }
 0x30e   : > { %v987_v57 = vpop.f32.mrb[6].mxu0  ;;  %v1457_v58 = vpop.f32.mrb[5].mxu1 }
 0x30f   : > { %v1064_v59 = vcombine.low %v841_v54, %v987_v57  ;;  %v1065_v60 = vcombine.high %v841_v54, %v987_v57  ;;  %v1462_v61 = vpop.f32.mrb[7].mxu0 }
 0x311   : > { %v1060_v62 = vpop.f32.mrb[6].mxu1  ;;  %v1072_v3 = vrot.slane %v1064_v59, %v1729_v8  ;;  %v1079_v4 = vrot.slane %v1065_v60, %v1729_v8 }
 0x312   : > { %v1080_v63 = vcombine.low %v914_v56, %v1060_v62  ;;  %v1081_v0 = vcombine.high %v914_v56, %v1060_v62  ;;  %v1467_v2 = vpop.f32.mrb[7].mxu1 }
 0x314   : > { %v1088_v1 = vrot.slane %v1080_v63, %v1729_v8  ;;  %v1095_v5 = vrot.slane %v1081_v0, %v1729_v8 }
 0x316   : > { %v1096_v6 = vcombine.low %v1072_v3, %v1088_v1  ;;  %v1097_v7 = vcombine.high %v1072_v3, %v1088_v1  ;;  %v1112_v9 = vcombine.low %v1079_v4, %v1095_v5  ;;  %v1113_v10 = vcombine.high %v1079_v4, %v1095_v5 }
 0x318   : > { %v1104_v11 = vrot.slane %v1096_v6, %v1736_v15  ;;  %v1111_v12 = vrot.slane %v1097_v7, %v1736_v15  ;;  %v1120_v13 = vrot.slane %v1112_v9, %v1736_v15  ;;  %v1127_v14 = vrot.slane %v1113_v10, %v1736_v15 }
 0x31a   : > { %v1132_v16 = vcombine.low %v1104_v11, %v1111_v12  ;;  %v1404_v17 = vcombine.high %v1104_v11, %v1111_v12  ;;  %v1148_v18 = vcombine.low %v1120_v13, %v1127_v14  ;;  %v1405_v19 = vcombine.high %v1120_v13, %v1127_v14 }
 0x31c   : > { %v1139_v20 = vrot.slane %v1132_v16, %v1729_v8  ;;  %v1147_v21 = vrot.slane %v1404_v17, %v1729_v8  ;;  %v1155_v22 = vrot.slane %v1148_v18, %v1729_v8  ;;  %v1163_v23 = vrot.slane %v1405_v19, %v1729_v8 }
 0x31e   : > { %v1165_v24 = vcombine.high %v1139_v20, %v1147_v21  ;;  %v1181_v25 = vcombine.high %v1155_v22, %v1163_v23  ;;  %v1164_v26 = vcombine.low %v1139_v20, %v1147_v21  ;;  %v1180_v27 = vcombine.low %v1155_v22, %v1163_v23 }
 0x320   : > { %v1179_v28 = vrot.slane %v1165_v24, %v1736_v15  ;;  %v1195_v29 = vrot.slane %v1181_v25, %v1736_v15  ;;  %v1172_v30 = vrot.slane %v1164_v26, %v1736_v15  ;;  %v1188_v31 = vrot.slane %v1180_v27, %v1736_v15 }
 0x322   : > { %v1198_v32 = vcombine.low %v1179_v28, %v1195_v29  ;;  %v1197_v33 = vcombine.high %v1172_v30, %v1188_v31  ;;  %v1199_v34 = vcombine.high %v1179_v28, %v1195_v29  ;;  %v1196_v35 = vcombine.low %v1172_v30, %v1188_v31 }
 0x324   : > { %1205 = vrot.lane.b32.xlu1 %v1198_v32, %s1628_s3  ;;  %1201 = vrot.lane.b32.xlu0 %v1197_v33, %s1629_s4 }
 0x328   : > { %1209 = vrot.lane.b32.xlu1 %v1199_v34, %s1630_s5 }
 0x396   : > { %v1206_v8 = vpop.permute.xlu1 %1205  ;;  %v1202_v36 = vpop.permute.xlu0 %1201 }
 0x397   : > { %v1212_v37 = vsel %vm415_vm1, %v1196_v35, %v1202_v36 }
 0x398   : > { %v1214_v38 = vsel %vm1213_vm2, %v1212_v37, %v1206_v8 }
 0x39a   : > { %v1210_v15 = vpop.permute.xlu1 %1209 }
 0x39b   : > { %v1216_v39 = vsel %vm1215_vm3, %v1214_v38, %v1210_v15 }
 0x39c   : > { %1218 = vst.msk [vmem:[%s185_s15] sm:$0xff] %vm1217_vm4, %v1216_v39 }
 0x39d   : > { %s1411_s18 = sshll.u32 %s1614_s12, 9  ;;  %s1261_s20 = sshll.u32 %s1754_s30, 4  ;;  %s1262_s20 = int_to_ptr.vmem [resolvable:$true] %s1261_s20 }
 0x39e   : > { %s1244_s26 = scalar_lea.hbm %s1892_s2, %s1411_s18  ;;  %s1631_s27 = smov 512  }
 0x39f   : > { %1469 = sst [smem:[#allocation5]] (%p1693_p4), %s1631_s27  ;;  %s1632_s23 = smov 1024  }
 0x3a0   : > { %1470 = sst [smem:[#allocation5 + $0x1]] (%p1693_p4), %s1632_s23  ;;  %s1633_s28 = smov 4  }
 0x3a1   : > { %1471 = sst [smem:[#allocation5 + $0x2]] (%p1693_p4), %s1633_s28  ;;  %s1634_s29 = smov 128  }
 0x3a2   : > { %1472 = sst [smem:[#allocation5 + $0x3]] (%p1693_p4), %s1634_s29  ;;  %s1635_s12 = smov 8  }
 0x3a3   : > { %1473 = sst [smem:[#allocation5 + $0x4]] (%p1693_p4), %s1634_s29  ;;  %s1636_s30 = smov [#allocation4]  }
 0x3a4   : > { %1474 = sst [smem:[#allocation5 + $0x5]] (%p1693_p4), %s1635_s12  ;;  %s1637_s3 = smov 0  }
 0x3a5   : > { %1475 = dma.general (%p1693_p4), %s1262_s20, 1024, %s1244_s26, %s1227_s16, %s1636_s30, [#allocation5], %s1637_s3, 0  }
 0x3a6 PF: > { %p1481_p12 = scmp.ge.s32.totalorder %s1622_s14, 2  ;;  %s1299_s4 = sand.u32 1, %s1602_s9  }
 0x3a7   : > { %s1300_s5 = scalar_lea.sflag [#allocation3], %s1299_s4 }
 0x3a8   : > { %p1478_p13 = pnand %p1481_p12, %p1700_p8 }
 0x3aa   : > { %1597 = dma.done.wait (!%p1478_p13), %s1300_s5, 1024  }
 0x3ab   : > { %1599 = vsyncadd (!%p1478_p13), %s1300_s5, 4294966272  ;;  %s16_s14 = sadd.s32 1, %s1622_s14   ;;  %s1895_s9 = smov %s1606_s10 }
 0x3ac   : > { %p13_p0 = scmp.ge.s32.totalorder %s16_s14, 4   ;;  %s1896_s10 = smov %s1610_s11 }
 0x3ad   : > { %s1897_s11 = smov %s1706_s22  ;;  %s1898_s12 = smov %s1618_s13 }
 0x3ae   : > { %s1899_s13 = smov %s1901_s17  ;;  %15 = sbr.rel (!%p13_p0) target bundleno = 4 (0x4), region = 76 }
 0x3b5   :  { %1305 = vsyncpa [#allocation3], 1 }
 0x3b6   :  { %1307 = vsyncpa [#allocation3 + $0x1], 1 }

// kernel: attention_decoder_forward.15
= control target key start
LH: loop header
LB: loop body
LE: loop exit
PB: predicated region body
PF: predicated region fallthrough
CT: control target
= control target key end

     0   :  { %vm21_vm0 = vcmask 261120   ;;  %v235_v3 = vmov 0.0   ;;  %s336_s1 = inlined_call_operand.vmem [shape: f32[128,32], index: 1, kind: input, shape index: {}]   ;;  %s337_s0 = inlined_call_operand.vmem [shape: f32[16,128], index: 0, kind: input, shape index: {}]   ;;  %s338_s2 = inlined_call_operand.vmem [shape: f32[1,32], index: 2, kind: input, shape index: {}]   ;;  %s339_s3 = inlined_call_operand.vmem [shape: f32[16,32], index: 3, kind: input, shape index: {}]   ;;  %s340_s4 = inlined_call_operand.vmem [shape: f32[16,32], index: 4, kind: output, shape index: {}]  }
   0x1   :  { %v28_v0 = vld [vmem:[%s336_s1] sm:$0xff]  ;;  %v29_v1 = vld [vmem:[%s336_s1 + $0x8] sm:$0xff]  ;;  %v30_v2 = vld [vmem:[%s336_s1 + $0x10] sm:$0xff]  ;;  %23 = vst.msk [vmem:[#allocation2 + $0x8] sm:$0xff] %vm21_vm0, %v235_v3 }
   0x2   :  { %22 = vst.msk [vmem:[#allocation2] sm:$0xff] %vm21_vm0, %v235_v3  ;;  %v202_v4 = vpack.c.bf16 %v29_v1, %v28_v0  ;;  %v31_v5 = vld [vmem:[%s336_s1 + $0x18] sm:$0xff]  ;;  %v32_v7 = vld [vmem:[%s336_s1 + $0x20] sm:$0xff]  ;;  %v33_v8 = vld [vmem:[%s336_s1 + $0x28] sm:$0xff] }
   0x3   :  { %v206_v6 = vpack.c.bf16 %v31_v5, %v30_v2  ;;  %v210_v9 = vpack.c.bf16 %v33_v8, %v32_v7  ;;  %v26_v10 = vld [vmem:[%s337_s0] sm:$0xff]  ;;  %v34_v11 = vld [vmem:[%s336_s1 + $0x30] sm:$0xff]  ;;  %v35_v12 = vld [vmem:[%s336_s1 + $0x38] sm:$0xff] }
   0x4   :  { %203 = vmatprep.subr.bf16.mxu0 %v202_v4  ;;  %199 = vmatprep.mubr.f32.mxu0 %v26_v10  ;;  %v214_v13 = vpack.c.bf16 %v35_v12, %v34_v11  ;;  %v36_v14 = vld [vmem:[%s336_s1 + $0x40] sm:$0xff]  ;;  %v37_v15 = vld [vmem:[%s336_s1 + $0x48] sm:$0xff]  ;;  %v38_v17 = vld [vmem:[%s336_s1 + $0x50] sm:$0xff] }
   0x5   :  { %205 = vmatpush3.bf16.msra.mxu0 %v202_v4  ;;  %v218_v16 = vpack.c.bf16 %v37_v15, %v36_v14  ;;  %v39_v18 = vld [vmem:[%s336_s1 + $0x58] sm:$0xff]  ;;  %v40_v20 = vld [vmem:[%s336_s1 + $0x60] sm:$0xff]  ;;  %v41_v21 = vld [vmem:[%s336_s1 + $0x68] sm:$0xff] }
   0x6   :  { %207 = vmatprep.subr.bf16.mxu0 %v206_v6  ;;  %v222_v19 = vpack.c.bf16 %v39_v18, %v38_v17  ;;  %v226_v22 = vpack.c.bf16 %v41_v21, %v40_v20  ;;  %v42_v23 = vld [vmem:[%s336_s1 + $0x70] sm:$0xff]  ;;  %v43_v24 = vld [vmem:[%s336_s1 + $0x78] sm:$0xff]  ;;  %v27_v26 = vld [vmem:[%s337_s0 + $0x8] sm:$0xff] }
   0x7   :  { %v230_v25 = vpack.c.bf16 %v43_v24, %v42_v23  ;;  %v148_v33 = vld [vmem:[%s338_s2] ss:$0 sm:$0xff]  ;;  %v139_v35 = vld [vmem:[%s339_s3 + $0x8] sm:$0xff] }
   0x8   :  { %v25_v27 = vld [vmem:[#allocation2 + $0x8] sm:$0xff]  ;;  %v138_v37 = vld [vmem:[%s339_s3] sm:$0xff] }
   0x9   :  { %209 = vmatpush3.bf16.msra.mxu0 %v206_v6  ;;  %v24_v28 = vld [vmem:[#allocation2] sm:$0xff] }
   0xa   :  { %211 = vmatprep.subr.bf16.mxu0 %v210_v9 }
   0xd   :  { %213 = vmatpush3.bf16.msra.mxu0 %v210_v9 }
   0xe   :  { %215 = vmatprep.subr.bf16.mxu0 %v214_v13 }
  0x11   :  { %217 = vmatpush3.bf16.msra.mxu0 %v214_v13 }
  0x12   :  { %219 = vmatprep.subr.bf16.mxu0 %v218_v16 }
  0x15   :  { %221 = vmatpush3.bf16.msra.mxu0 %v218_v16 }
  0x16   :  { %223 = vmatprep.subr.bf16.mxu0 %v222_v19 }
  0x19   :  { %225 = vmatpush3.bf16.msra.mxu0 %v222_v19 }
  0x1a   :  { %227 = vmatprep.subr.bf16.mxu0 %v226_v22 }
  0x1d   :  { %229 = vmatpush3.bf16.msra.mxu0 %v226_v22 }
  0x1e   :  { %231 = vmatprep.subr.bf16.mxu0 %v230_v25 }
  0x21   :  { %233 = vmatpush3.bf16.msra.mxu0 %v230_v25 }
  0x24   :  { %200 = vmatmul.mubr.f32.vlgmr.msra.gmra.mrb[0].mxu0 %v27_v26 }
  0xf7   :  { %v201_v29 = vpop.f32.mrb[0].mxu0 }
  0xf8   :  { %v120_v30 = vadd.f32 %v201_v29, %v25_v27  ;;  %v110_v31 = vpop.f32.mrb[1].mxu0 }
  0xf9   :  { %v119_v32 = vadd.f32 %v110_v31, %v24_v28 }
  0xfa   :  { %123 = vst.msk [vmem:[#allocation2 + $0x8] sm:$0xff] %vm21_vm0, %v120_v30 }
  0xfb   :  { %122 = vst.msk [vmem:[#allocation2] sm:$0xff] %vm21_vm0, %v119_v32 }
 0x101   :  { %v128_v34 = vld [vmem:[#allocation2 + $0x8] sm:$0xff] }
 0x102   :  { %v137_v36 = vadd.f32 %v148_v33, %v128_v34  ;;  %v127_v38 = vld [vmem:[#allocation2] sm:$0xff] }
 0x103   :  { %v136_v39 = vadd.f32 %v148_v33, %v127_v38 }
 0x104   :  { %v141_v40 = vadd.f32 %v139_v35, %v137_v36 }
 0x105   :  { %v140_v41 = vadd.f32 %v138_v37, %v136_v39 }
 0x106   :  { %143 = vst.msk [vmem:[%s340_s4 + $0x8] sm:$0xff] %vm21_vm0, %v141_v40 }
 0x107   :  { %142 = vst.msk [vmem:[%s340_s4] sm:$0xff] %vm21_vm0, %v140_v41 }

// kernel: attention_decoder_forward.21
= control target key start
LH: loop header
LB: loop body
LE: loop exit
PB: predicated region body
PF: predicated region fallthrough
CT: control target
= control target key end

     0   :  { %vm27_vm0 = vcmask 261120   ;;  %s331_s0 = inlined_call_operand.vmem [shape: f32[16,32], index: 0, kind: input, shape index: {}]   ;;  %s332_s1 = inlined_call_operand.vmem [shape: f32[1,32], index: 1, kind: input, shape index: {}]   ;;  %s333_s2 = inlined_call_operand.vmem [shape: f32[1,32], index: 2, kind: input, shape index: {}]   ;;  %s334_s3 = inlined_call_operand.vmem [shape: f32[32,32], index: 3, kind: input, shape index: {}]   ;;  %s335_s4 = inlined_call_operand.vmem [shape: f32[1,32], index: 4, kind: input, shape index: {}]   ;;  %s336_s5 = inlined_call_operand.hbm [shape: f32[16,32], index: 5, kind: output, shape index: {}]  }
   0x1   :  { %v25_v0 = vld [vmem:[%s331_s0] sm:$0xff]  ;;  %v26_v1 = vld [vmem:[%s331_s0 + $0x8] sm:$0xff] }
   0x2   :  { %10 = vsyncpa [#allocation4], 0  ;;  %v28_v2 = vsel %vm27_vm0, %v25_v0, 0.0  ;;  %v31_v3 = vsel %vm27_vm0, %v26_v1, 0.0  ;;  %v77_v14 = vld [vmem:[%s334_s3] sm:$0xff]  ;;  %v78_v15 = vld [vmem:[%s334_s3 + $0x8] sm:$0xff] }
   0x3   :  { %29 = vadd.xlane.f32.xlu0 %v28_v2  ;;  %v210_v16 = vpack.c.bf16 %v78_v15, %v77_v14  ;;  %v79_v17 = vld [vmem:[%s334_s3 + $0x10] sm:$0xff]  ;;  %v80_v18 = vld [vmem:[%s334_s3 + $0x18] sm:$0xff]  ;;  %v188_v27 = vld [vmem:[%s332_s1] ss:$0 sm:$0xff] }
   0x4   :  { %v214_v19 = vpack.c.bf16 %v80_v18, %v79_v17  ;;  %v189_v29 = vld [vmem:[%s333_s2] ss:$0 sm:$0xff]  ;;  %s249_s2 = smov [#allocation3]  }
   0x5   :  { %211 = vmatprep.subr.bf16.mxu0 %v210_v16  ;;  %v190_v38 = vld [vmem:[%s335_s4] ss:$0 sm:$0xff]  ;;  %s177_s8 = sshll.u32 %s249_s2, 4  ;;  %s178_s8 = int_to_ptr.vmem [resolvable:$true] %s177_s8 }
   0x6   :  { %213 = vmatpush3.bf16.msra.mxu0 %v210_v16  ;;  %s225_s9 = scalar_lea.vmem %s178_s8, 256  ;;  %p230_p1 = scmp.lt.s32.totalorder %s178_s8, %s178_s8 }
   0x7   :  { %32 = vadd.xlane.f32.xlu0 %v31_v3  ;;  %215 = vmatprep.subr.bf16.mxu0 %v214_v19  ;;  %p226_p0 = scmp.ne.s32.totalorder %s178_s8, %s225_s9  ;;  %p231_p2 = scmp.lt.s32.totalorder %s225_s9, %s225_s9 }
   0x9   :  { %p232_p3 = por %p231_p2, %p230_p1 }
   0xa   :  { %217 = vmatpush3.bf16.msra.mxu0 %v214_v19 }
   0xb   :  { %p233_p4 = pnand %p232_p3, %p226_p0 }
  0x90   :  { %v30_v4 = vpop.xlane.xlu0 %29 }
  0x91   :  { %v35_v5 = vmul.f32 0.03125, %v30_v4 }
  0x93   :  { %v37_v6 = vsub.f32 %v25_v0, %v35_v5 }
  0x94   :  { %v33_v7 = vpop.xlane.xlu0 %32 }
  0x95   :  { %v36_v8 = vmul.f32 0.03125, %v33_v7  ;;  %v39_v9 = vmul.f32 %v37_v6, %v37_v6 }
  0x97   :  { %v38_v10 = vsub.f32 %v26_v1, %v36_v8  ;;  %v41_v11 = vsel %vm27_vm0, %v39_v9, 0.0 }
  0x98   :  { %42 = vadd.xlane.f32.xlu1 %v41_v11 }
  0x99   :  { %v40_v12 = vmul.f32 %v38_v10, %v38_v10 }
  0x9b   :  { %v44_v13 = vsel %vm27_vm0, %v40_v12, 0.0 }
  0x9c   :  { %45 = vadd.xlane.f32.xlu1 %v44_v13 }
 0x125   :  { %v43_v20 = vpop.xlane.xlu1 %42 }
 0x126   :  { %v47_v21 = vmul.f32 0.03125, %v43_v20 }
 0x128   :  { %v49_v22 = vadd.f32 1e-05, %v47_v21 }
 0x129   :  { %v46_v23 = vpop.xlane.xlu1 %45 }
 0x12a   :  { %221 = vrsqrt.f32 %v49_v22  ;;  %v48_v24 = vmul.f32 0.03125, %v46_v23 }
 0x12c   :  { %v50_v25 = vadd.f32 1e-05, %v48_v24 }
 0x12e   :  { %223 = vrsqrt.f32 %v50_v25 }
 0x134   :  { %v222_v26 = vpop.eup %221 }
 0x135   :  { %v53_v28 = vmul.f32 %v222_v26, %v37_v6 }
 0x137   :  { %v62_v30 = vmul.f32 %v188_v27, %v53_v28 }
 0x138   :  { %v224_v31 = vpop.eup %223 }
 0x139   :  { %v71_v32 = vadd.f32 %v189_v29, %v62_v30  ;;  %v54_v33 = vmul.f32 %v224_v31, %v38_v10 }
 0x13b   :  { %73 = vst.msk [vmem:[#allocation2] sm:$0xff] %vm27_vm0, %v71_v32  ;;  %v63_v34 = vmul.f32 %v188_v27, %v54_v33 }
 0x13d   :  { %v72_v35 = vadd.f32 %v189_v29, %v63_v34 }
 0x13f   :  { %74 = vst.msk [vmem:[#allocation2 + $0x8] sm:$0xff] %vm27_vm0, %v72_v35 }
 0x142   :  { %v75_v36 = vld [vmem:[#allocation2] sm:$0xff] }
 0x143   :  { %207 = vmatprep.mubr.msk.f32.mxu0 %vm27_vm0, %v75_v36 }
 0x146   :  { %v76_v37 = vld [vmem:[#allocation2 + $0x8] sm:$0xff] }
 0x147   :  { %208 = vmatmul.mubr.msk.f32.vlgmr.msra.gmra.mrb[0].mxu0 %vm27_vm0, %v76_v37 }
 0x21a   :  { %v209_v39 = vpop.f32.mrb[0].mxu0 }
 0x21b   :  { %v167_v40 = vadd.f32 %v209_v39, %v190_v38  ;;  %v161_v41 = vpop.f32.mrb[1].mxu0 }
 0x21c   :  { %v162_v42 = vadd.f32 %v190_v38, %v161_v41 }
 0x21d   :  { %171 = vst.msk [vmem:[#allocation3 + $0x8] sm:$0xff] %vm27_vm0, %v167_v40 }
 0x21e   :  { %170 = vst.msk [vmem:[#allocation3] sm:$0xff] %vm27_vm0, %v162_v42 }
 0x21f   :  { %236 = shalt.err (!%p233_p4)
}
 0x220   :  { %s237_s11 = scalar_lea.hbm %s336_s5, 256 }
 0x221   :  { %p238_p5 = scmp.ne.s32.totalorder %s336_s5, %s237_s11  ;;  %p241_p6 = scmp.lt.u32.totalorder %s237_s11, %s336_s5 }
 0x223   :  { %p243_p7 = pnand %p241_p6, %p238_p5 }
 0x225   :  { %246 = shalt.err (!%p243_p7)
}
 0x226   :  { %s250_s16 = smov 128   ;;  %s251_s17 = smov 8  }
 0x227   :  { %183 = dma.vmem_to_hbm [thread:$0]  %s178_s8, 256, %s336_s5, [#allocation4], %s250_s16, %s250_s16, %s251_s17  }
 0x228   :  { %247 = dma.done.wait [#allocation4], 256  }
 0x229   :  { %248 = vsyncadd [#allocation4], 4294967040 }
 0x22a   :  { %187 = vsyncpa [#allocation4], 1 }

</bundles_post_ra>
